<compile_context>
chip_gen: v7x
topology: tpu7x:2x2x1
jax: 0.10.0
libtpu: 0.0.40
codegen_flags: <defaults>
</compile_context>

<pallas_src>
import functools

import jax
import jax.numpy as jnp
import numpy as np
from jax import lax
from jax.experimental import pallas as pl
from jax.experimental.pallas import tpu as pltpu


def _round_up(v, m):
    return ((v + m - 1) // m) * m


# ----------------------------------------------------------------------------
# Fused GeneratorBlock kernel
# ----------------------------------------------------------------------------
def _fused_block_kernel(*refs, M, W, PAD, first, last, blend, alpha):
    """One full GeneratorBlock on one image (one grid step).

    refs layout:
      scales (SMEM, (4,)), colid (M,1) int32, x, w1, b1, w2, b2,
      [w_rgb, b_rgb]        if last,
      [w_prev, b_prev]      if blend,
      out, scratch (VMEM (M + 2*PAD, C1) f32).
    """
    it = iter(refs)
    scales_ref = next(it)
    colid_ref = next(it)
    x_ref = next(it)                 # first: (M, 16*Cin) patches ; else (M + 2*PAD, Cin)
    w1_ref = next(it)
    b1_ref = next(it)
    w2_ref = next(it)
    b2_ref = next(it)
    if last:
        wr_ref = next(it)
        br_ref = next(it)
    if blend:
        wp_ref = next(it)
        bp_ref = next(it)
    o_ref = next(it)                 # (M, Cout_final)
    scr_ref = next(it)               # VMEM scratch, zero-padded row buffer

    col = colid_ref[...]             # (M, 1) int32, column (wo) of each flat row

    def shift_conv3x3(src_ref, w_ref_l, scale):
        """Same-size 3x3 / stride 1 / pad 1 conv on the flat (M, C) layout.

        src_ref rows [PAD, PAD + M) hold the activation; >= W+1 zero rows on
        each side absorb the vertical out-of-range taps, horizontal wrap-around
        is masked with the column index.
        """
        cout = w_ref_l.shape[-1]
        acc = jnp.zeros((M, cout), jnp.float32)
        for i in range(3):
            for j in range(3):
                dy, dx = i - 1, j - 1
                s = dy * W + dx
                tap = src_ref[PAD + s:PAD + s + M, :]
                if dx != 0:
                    ok = jnp.logical_and(col + dx >= 0, col + dx < W)
                    tap = jnp.where(ok, tap, 0.0)
                wt = (w_ref_l[i * 3 + j] * scale).astype(jnp.bfloat16)
                acc = acc + jnp.dot(tap.astype(jnp.bfloat16), wt,
                                    preferred_element_type=jnp.float32)
        return acc

    def bias_pn_lrelu(y, b_ref_l):
        y = y + b_ref_l[...]                                   # conv bias
        m = jnp.mean(y * y, axis=-1, keepdims=True)            # PixelwiseNormalization
        y = y * lax.rsqrt(m + 1e-8)
        return jnp.where(y >= 0.0, y, 0.2 * y)                 # LeakyReLU(0.2)

    # --- conv1 ---------------------------------------------------------------
    s1 = scales_ref[0]
    if first:
        # 4x4 / pad-3 conv on a 1x1 latent == one dense matmul.
        w1 = (w1_ref[...] * s1).astype(jnp.bfloat16)
        h = jnp.dot(x_ref[...].astype(jnp.bfloat16), w1,
                    preferred_element_type=jnp.float32)
    else:
        h = shift_conv3x3(x_ref, w1_ref, s1)
    h = bias_pn_lrelu(h, b1_ref)

    # --- conv2 (intermediate stays in VMEM) ----------------------------------
    scr_ref[...] = jnp.zeros_like(scr_ref)
    scr_ref[PAD:PAD + M, :] = h
    h = bias_pn_lrelu(shift_conv3x3(scr_ref, w2_ref, scales_ref[1]), b2_ref)

    # --- toRGB / alpha blend --------------------------------------------------
    if last:
        scr_ref[PAD:PAD + M, :] = h
        rgb = shift_conv3x3(scr_ref, wr_ref, scales_ref[2]) + br_ref[...]
        if blend:
            prev = shift_conv3x3(x_ref, wp_ref, scales_ref[3]) + bp_ref[...]
            rgb = (1.0 - alpha) * prev + alpha * rgb
        o_ref[...] = rgb.astype(o_ref.dtype)
    else:
        o_ref[...] = h.astype(o_ref.dtype)


# ----------------------------------------------------------------------------
# Wrapper: one fused pallas_call per GeneratorBlock
# ----------------------------------------------------------------------------
def _conv_w_flat(p):
    w = p["w"]                                    # (Cout, Cin, 3, 3) OIHW
    cout, cin, kh, kw = w.shape
    wt = jnp.transpose(w, (2, 3, 1, 0)).reshape(kh * kw, cin, cout)
    return wt, p["b"].reshape(1, cout), p["scale"]


def _first_conv_dense(p, x_lat):
    """4x4 / pad-3 conv on the 1x1 latent as a (B, 16, 16*Cin) patches matmul."""
    w = p["w"]                                    # (C1, Cin, 4, 4)
    c1, cin, kh, kw = w.shape
    b = x_lat.shape[0]
    xp = jnp.pad(x_lat[:, None, None, :], ((0, 0), (3, 3), (3, 3), (0, 0)))
    cols = [xp[:, i:i + 4, j:j + 4, :] for i in range(kh) for j in range(kw)]
    patches = jnp.concatenate(cols, axis=-1).reshape(b, 16, kh * kw * cin)
    wmat = jnp.transpose(w, (2, 3, 1, 0)).reshape(kh * kw * cin, c1)
    return patches, wmat, p["b"].reshape(1, c1), p["scale"]


def run_block(bp, x, *, first, last, prev_rgb=None, alpha=1.0):
    """x: latent (B, Cin) if first else NHWC (B, H, W, Cin). Returns NHWC."""
    blend = prev_rgb is not None
    B = x.shape[0]
    if first:
        H = W = 4
        x_in, w1, b1, s1 = _first_conv_dense(bp["conv1"], x)
    else:
        _, H, W, cin = x.shape
        w1, b1, s1 = _conv_w_flat(bp["conv1"])
    M = H * W
    PAD = _round_up(W + 1, 8)
    if not first:
        x_in = jnp.pad(x.reshape(B, M, cin), ((0, 0), (PAD, PAD), (0, 0)))

    w2, b2, s2 = _conv_w_flat(bp["conv2"])
    c1 = w2.shape[-1]
    colid = (jnp.arange(M, dtype=jnp.int32) % W).reshape(M, 1)

    inputs = [colid, x_in, w1, b1, w2, b2]
    specs = [
        pl.BlockSpec((M, 1), lambda b: (0, 0)),
        pl.BlockSpec((None,) + x_in.shape[1:], lambda b: (b, 0, 0)),
        pl.BlockSpec(w1.shape, lambda b: (0,) * w1.ndim),
        pl.BlockSpec(b1.shape, lambda b: (0, 0)),
        pl.BlockSpec(w2.shape, lambda b: (0, 0, 0)),
        pl.BlockSpec(b2.shape, lambda b: (0, 0)),
    ]
    scales = [s1, s2]
    if last:
        wr, br, sr = _conv_w_flat(bp["toRGB"])
        inputs += [wr, br]
        specs += [pl.BlockSpec(wr.shape, lambda b: (0, 0, 0)),
                  pl.BlockSpec(br.shape, lambda b: (0, 0))]
        scales.append(sr)
        cout = br.shape[-1]
    else:
        scales.append(jnp.float32(1.0))
        cout = c1
    if blend:
        wp, bpv, sp = _conv_w_flat(prev_rgb)
        inputs += [wp, bpv]
        specs += [pl.BlockSpec(wp.shape, lambda b: (0, 0, 0)),
                  pl.BlockSpec(bpv.shape, lambda b: (0, 0))]
        scales.append(sp)
    else:
        scales.append(jnp.float32(1.0))
    scales_arr = jnp.stack([jnp.asarray(s, jnp.float32) for s in scales])

    kernel = functools.partial(_fused_block_kernel, M=M, W=W, PAD=PAD,
                               first=first, last=last, blend=blend,
                               alpha=float(alpha))
    out = pl.pallas_call(
        kernel,
        out_shape=jax.ShapeDtypeStruct((B, M, cout), jnp.float32),
        grid=(B,),
        in_specs=[pl.BlockSpec(memory_space=pltpu.SMEM)] + specs,
        out_specs=pl.BlockSpec((None, M, cout), lambda b: (b, 0, 0)),
        scratch_shapes=[pltpu.VMEM((M + 2 * PAD, c1), jnp.float32)],
        compiler_params=pltpu.CompilerParams(
            dimension_semantics=("parallel",),
            vmem_limit_bytes=32 * 1024 * 1024),
    )(scales_arr, *inputs)
    return out.reshape(B, H, W, cout)


def _upsample2x_nhwc(x):
    # F.interpolate(scale_factor=2), default 'nearest'.
    # TODO(synk): fold the 2x nearest upsample into the next block's in-kernel
    # tap indexing to remove this 4x HBM round trip.
    return jnp.repeat(jnp.repeat(x, 2, axis=1), 2, axis=2)


@functools.partial(jax.jit, static_argnames=("depth", "alpha"))
def generator_forward(block_params, x, depth=0, alpha=1.0):
    # x: (B, num_fmap(0)) latent  ->  NCHW image.
    h = run_block(block_params[0], x, first=True, last=(depth == 0))
    rgb = h
    if depth > 0:
        for i in range(depth - 1):
            h = _upsample2x_nhwc(h)
            h = run_block(block_params[i + 1], h, first=False, last=False)
        h = _upsample2x_nhwc(h)
        if alpha < 1.0:
            rgb = run_block(block_params[depth], h, first=False, last=True,
                            prev_rgb=block_params[depth - 1]["toRGB"], alpha=alpha)
        else:
            rgb = run_block(block_params[depth], h, first=False, last=True)
    return jnp.transpose(rgb, (0, 3, 1, 2))                   # NHWC -> NCHW


# ----------------------------------------------------------------------------
# Parameter construction (deterministic, mirrors WeightScaledConv2d.__init__)
# ----------------------------------------------------------------------------
def make_ws_conv_params(key, cin, cout, ksize, pad):
    kw_, kb_ = jax.random.split(key)
    fan_in = cin * ksize * ksize
    std = float(np.sqrt(2.0 / fan_in))                        # kaiming_normal_
    w = jax.random.normal(kw_, (cout, cin, ksize, ksize), jnp.float32) * std
    scale = jnp.sqrt(jnp.mean(w * w))                         # self.scale
    w = w / scale                                             # weight /= scale
    bound = float(1.0 / np.sqrt(fan_in))                      # default Conv2d bias init
    b = jax.random.uniform(kb_, (cout,), jnp.float32, -bound, bound)
    return {"w": w, "b": b, "scale": scale, "pad": pad}


def build_generator_params(key, num_depth, num_channels, num_fmap):
    blocks = []
    for j in range(num_depth):
        cin, cout = num_fmap(j), num_fmap(j + 1)
        first = (j == 0)
        key, k1, k2, k3 = jax.random.split(key, 4)
        conv1 = make_ws_conv_params(k1, cin, cout, 4 if first else 3, 3 if first else 1)
        conv2 = make_ws_conv_params(k2, cout, cout, 3, 1)
        to_rgb = make_ws_conv_params(k3, cout, num_channels, 3, 1)
        blocks.append({"conv1": conv1, "conv2": conv2, "toRGB": to_rgb})
    return blocks


# ----------------------------------------------------------------------------
# Pure-JAX reference (NCHW, matches PyTorch semantics) for verification
# ----------------------------------------------------------------------------
def _ref_ws_conv(x_nchw, p):
    x = x_nchw * p["scale"]
    y = lax.conv_general_dilated(
        x, p["w"], (1, 1), [(p["pad"], p["pad"])] * 2,
        dimension_numbers=("NCHW", "OIHW", "NCHW"),
        precision=lax.Precision.HIGHEST)
    return y + p["b"][None, :, None, None]


def _ref_pixel_norm(x):
    return x * lax.rsqrt(jnp.mean(x * x, axis=1, keepdims=True) + 1e-8)


def _ref_leaky(x):
    return jnp.where(x >= 0.0, x, 0.2 * x)


def _ref_block(p, x, last):
    x = _ref_leaky(_ref_pixel_norm(_ref_ws_conv(x, p["conv1"])))
    x = _ref_leaky(_ref_pixel_norm(_ref_ws_conv(x, p["conv2"])))
    if last:
        x = _ref_ws_conv(x, p["toRGB"])
    return x


def ref_generator_forward(block_params, x, depth=0, alpha=1.0):
    x = x[:, :, None, None]
    rgb = x = _ref_block(block_params[0], x, depth == 0)
    if depth > 0:
        for i in range(depth - 1):
            x = jnp.repeat(jnp.repeat(x, 2, axis=2), 2, axis=3)
            x = _ref_block(block_params[i + 1], x, False)
        x = jnp.repeat(jnp.repeat(x, 2, axis=2), 2, axis=3)
        rgb = _ref_block(block_params[depth], x, True)
        if alpha < 1.0:
            prev_rgb = _ref_ws_conv(x, block_params[depth - 1]["toRGB"])
            rgb = (1.0 - alpha) * prev_rgb + alpha * rgb
    return rgb


# ----------------------------------------------------------------------------
if __name__ == "__main__":
    key = jax.random.PRNGKey(0)

    num_depth = 3
    num_channels = 3
    fmaps = [32, 16, 16, 8]                      # num_fmap(0..num_depth)
    num_fmap = lambda i: fmaps[i]

    key, pkey, xkey = jax.random.split(key, 3)
    params = build_generator_params(pkey, num_depth, num_channels, num_fmap)

    B = 2
    x = jax.random.normal(xkey, (B, num_fmap(0)), jnp.float32)

    # Default module state: depth = 0, alpha = 1.0  ->  (B, num_channels, 4, 4)
    out0 = jax.block_until_ready(generator_forward(params, x, depth=0, alpha=1.0))
    ref0 = ref_generator_forward(params, x, depth=0, alpha=1.0)
    assert out0.shape == (B, num_channels, 4, 4)
    np.testing.assert_allclose(np.asarray(out0), np.asarray(ref0), rtol=3e-2, atol=3e-2)

    # Progressive-growing path: depth = 2, alpha = 0.5 -> (B, num_channels, 16, 16)
    out2 = jax.block_until_ready(generator_forward(params, x, depth=2, alpha=0.5))
    ref2 = ref_generator_forward(params, x, depth=2, alpha=0.5)
    assert out2.shape == (B, num_channels, 16, 16)
    np.testing.assert_allclose(np.asarray(out2), np.asarray(ref2), rtol=3e-2, atol=3e-2)

    print("KERNEL_OK")
</pallas_src>

<mosaic_0001>
module attributes {stable_mosaic.version = 11 : i64} {
  func.func @_fused_block_kernel(%arg0: i32, %arg1: memref<4xf32, #tpu.memory_space<smem>>, %arg2: memref<16x1xi32, #tpu.memory_space<vmem>>, %arg3: memref<1x16x512xf32, #tpu.memory_space<vmem>>, %arg4: memref<512x16xf32, #tpu.memory_space<vmem>>, %arg5: memref<1x16xf32, #tpu.memory_space<vmem>>, %arg6: memref<9x16x16xf32, #tpu.memory_space<vmem>>, %arg7: memref<1x16xf32, #tpu.memory_space<vmem>>, %arg8: memref<9x16x3xf32, #tpu.memory_space<vmem>>, %arg9: memref<1x3xf32, #tpu.memory_space<vmem>>, %arg10: memref<1x16x3xf32, #tpu.memory_space<vmem>>, %arg11: memref<32x16xf32, #tpu.memory_space<vmem>>) attributes {dimension_semantics = [#tpu.dimension_semantics<parallel>], iteration_bounds = array<i64: 2>, scalar_prefetch = 0 : i64, scratch_operands = 1 : i64, tpu.core_type = #tpu.core_type<tc>, window_params = [{transform_indices = @transform_0, window_bounds = array<i64: 4>}, {pipeline_mode = #tpu.pipeline_mode<synchronous>, transform_indices = @transform_1, window_bounds = array<i64: 16, 1>}, {transform_indices = @transform_2, window_bounds = array<i64: 1, 16, 512>}, {pipeline_mode = #tpu.pipeline_mode<synchronous>, transform_indices = @transform_3, window_bounds = array<i64: 512, 16>}, {pipeline_mode = #tpu.pipeline_mode<synchronous>, transform_indices = @transform_4, window_bounds = array<i64: 1, 16>}, {pipeline_mode = #tpu.pipeline_mode<synchronous>, transform_indices = @transform_5, window_bounds = array<i64: 9, 16, 16>}, {pipeline_mode = #tpu.pipeline_mode<synchronous>, transform_indices = @transform_6, window_bounds = array<i64: 1, 16>}, {pipeline_mode = #tpu.pipeline_mode<synchronous>, transform_indices = @transform_7, window_bounds = array<i64: 9, 16, 3>}, {pipeline_mode = #tpu.pipeline_mode<synchronous>, transform_indices = @transform_8, window_bounds = array<i64: 1, 3>}, {transform_indices = @transform_9, window_bounds = array<i64: 1, 16, 3>}]} {
    %c0 = arith.constant 0 : index
    %c0_0 = arith.constant 0 : index
    %0 = vector.load %arg2[%c0, %c0_0] : memref<16x1xi32, #tpu.memory_space<vmem>>, vector<16x1xi32>
    %c0_1 = arith.constant 0 : index
    %1 = memref.load %arg1[%c0_1] : memref<4xf32, #tpu.memory_space<smem>>
    %c0_2 = arith.constant 0 : index
    %c0_3 = arith.constant 0 : index
    %2 = vector.load %arg4[%c0_2, %c0_3] : memref<512x16xf32, #tpu.memory_space<vmem>>, vector<512x16xf32>
    %3 = vector.broadcast %1 : f32 to vector<512x16xf32>
    %4 = arith.mulf %2, %3 : vector<512x16xf32>
    %5 = arith.truncf %4 : vector<512x16xf32> to vector<512x16xbf16>
    %c0_4 = arith.constant 0 : index
    %c0_5 = arith.constant 0 : index
    %c0_6 = arith.constant 0 : index
    %6 = vector.load %arg3[%c0_4, %c0_5, %c0_6] : memref<1x16x512xf32, #tpu.memory_space<vmem>>, vector<1x16x512xf32>
    %7 = vector.shape_cast %6 : vector<1x16x512xf32> to vector<16x512xf32>
    %8 = arith.truncf %7 : vector<16x512xf32> to vector<16x512xbf16>
    %cst = arith.constant dense<0.000000e+00> : vector<16x16xf32>
    %9 = tpu.matmul %8, %5, %cst {dimension_numbers = #tpu.dot_dimension_numbers<[1], [0], [0], [1], [0, 0, 1, 1], [], []>} : vector<16x512xbf16>, vector<512x16xbf16>, vector<16x16xf32> -> vector<16x16xf32>
    %c0_7 = arith.constant 0 : index
    %c0_8 = arith.constant 0 : index
    %10 = vector.load %arg5[%c0_7, %c0_8] : memref<1x16xf32, #tpu.memory_space<vmem>>, vector<1x16xf32>
    %11 = vector.broadcast %10 : vector<1x16xf32> to vector<16x16xf32>
    %12 = arith.addf %9, %11 : vector<16x16xf32>
    %13 = arith.mulf %12, %12 : vector<16x16xf32>
    %cst_9 = arith.constant dense<0.000000e+00> : vector<16xf32>
    %14 = vector.multi_reduction <add>, %13, %cst_9 [1] : vector<16x16xf32> to vector<16xf32>
    %15 = vector.shape_cast %14 : vector<16xf32> to vector<16x1xf32>
    %cst_10 = arith.constant 1.600000e+01 : f32
    %16 = vector.broadcast %cst_10 : f32 to vector<16x1xf32>
    %17 = arith.divf %15, %16 : vector<16x1xf32>
    %cst_11 = arith.constant 9.99999993E-9 : f32
    %18 = vector.broadcast %cst_11 : f32 to vector<16x1xf32>
    %19 = arith.addf %17, %18 : vector<16x1xf32>
    %20 = math.rsqrt %19 : vector<16x1xf32>
    %21 = vector.broadcast %20 : vector<16x1xf32> to vector<16x16xf32>
    %22 = arith.mulf %12, %21 : vector<16x16xf32>
    %cst_12 = arith.constant 0.000000e+00 : f32
    %23 = vector.broadcast %cst_12 : f32 to vector<16x16xf32>
    %24 = arith.cmpf oge, %22, %23 : vector<16x16xf32>
    %cst_13 = arith.constant 2.000000e-01 : f32
    %25 = vector.broadcast %cst_13 : f32 to vector<16x16xf32>
    %26 = arith.mulf %25, %22 : vector<16x16xf32>
    %27 = arith.select %24, %22, %26 : vector<16x16xi1>, vector<16x16xf32>
    %cst_14 = arith.constant 0.000000e+00 : f32
    %28 = vector.broadcast %cst_14 : f32 to vector<32x16xf32>
    %c0_15 = arith.constant 0 : index
    %c0_16 = arith.constant 0 : index
    %29 = vector.load %arg11[%c0_15, %c0_16] : memref<32x16xf32, #tpu.memory_space<vmem>>, vector<32x16xf32>
    tpu.vector_store %arg11[%c0_15, %c0_16], %28 {strides = array<i32>} : memref<32x16xf32, #tpu.memory_space<vmem>>, vector<32x16xf32>,
    %c8 = arith.constant 8 : index
    %c0_17 = arith.constant 0 : index
    %30 = vector.load %arg11[%c8, %c0_17] : memref<32x16xf32, #tpu.memory_space<vmem>>, vector<16x16xf32>
    tpu.vector_store %arg11[%c8, %c0_17], %27 {strides = array<i32>} : memref<32x16xf32, #tpu.memory_space<vmem>>, vector<16x16xf32>,
    %c1 = arith.constant 1 : index
    %31 = memref.load %arg1[%c1] : memref<4xf32, #tpu.memory_space<smem>>
    %cst_18 = arith.constant 0.000000e+00 : f32
    %32 = vector.broadcast %cst_18 : f32 to vector<16x16xf32>
    %c3 = arith.constant 3 : index
    %c0_19 = arith.constant 0 : index
    %33 = vector.load %arg11[%c3, %c0_19] : memref<32x16xf32, #tpu.memory_space<vmem>>, vector<16x16xf32>
    %c-1_i32 = arith.constant -1 : i32
    %34 = vector.broadcast %c-1_i32 : i32 to vector<16x1xi32>
    %35 = arith.addi %0, %34 : vector<16x1xi32>
    %c0_i32 = arith.constant 0 : i32
    %36 = vector.broadcast %c0_i32 : i32 to vector<16x1xi32>
    %37 = arith.cmpi sge, %35, %36 : vector<16x1xi32>
    %c-1_i32_20 = arith.constant -1 : i32
    %38 = vector.broadcast %c-1_i32_20 : i32 to vector<16x1xi32>
    %39 = arith.addi %0, %38 : vector<16x1xi32>
    %c4_i32 = arith.constant 4 : i32
    %40 = vector.broadcast %c4_i32 : i32 to vector<16x1xi32>
    %41 = arith.cmpi slt, %39, %40 : vector<16x1xi32>
    %42 = arith.andi %37, %41 : vector<16x1xi1>
    %cst_21 = arith.constant 0.000000e+00 : f32
    %43 = vector.shape_cast %42 : vector<16x1xi1> to vector<16x1xi1>
    %44 = vector.broadcast %43 : vector<16x1xi1> to vector<16x16xi1>
    %45 = vector.broadcast %cst_21 : f32 to vector<16x16xf32>
    %46 = arith.select %44, %33, %45 : vector<16x16xi1>, vector<16x16xf32>
    %c0_22 = arith.constant 0 : index
    %c0_23 = arith.constant 0 : index
    %c0_24 = arith.constant 0 : index
    %47 = vector.load %arg6[%c0_22, %c0_23, %c0_24] : memref<9x16x16xf32, #tpu.memory_space<vmem>>, vector<1x16x16xf32>
    %48 = vector.shape_cast %47 : vector<1x16x16xf32> to vector<16x16xf32>
    %49 = vector.broadcast %31 : f32 to vector<16x16xf32>
    %50 = arith.mulf %48, %49 : vector<16x16xf32>
    %51 = arith.truncf %50 : vector<16x16xf32> to vector<16x16xbf16>
    %52 = arith.truncf %46 : vector<16x16xf32> to vector<16x16xbf16>
    %cst_25 = arith.constant dense<0.000000e+00> : vector<16x16xf32>
    %53 = tpu.matmul %52, %51, %cst_25 {dimension_numbers = #tpu.dot_dimension_numbers<[1], [0], [0], [1], [0, 0, 1, 1], [], []>} : vector<16x16xbf16>, vector<16x16xbf16>, vector<16x16xf32> -> vector<16x16xf32>
    %54 = arith.addf %32, %53 : vector<16x16xf32>
    %c4 = arith.constant 4 : index
    %c0_26 = arith.constant 0 : index
    %55 = vector.load %arg11[%c4, %c0_26] : memref<32x16xf32, #tpu.memory_space<vmem>>, vector<16x16xf32>
    %c1_27 = arith.constant 1 : index
    %c0_28 = arith.constant 0 : index
    %c0_29 = arith.constant 0 : index
    %56 = vector.load %arg6[%c1_27, %c0_28, %c0_29] : memref<9x16x16xf32, #tpu.memory_space<vmem>>, vector<1x16x16xf32>
    %57 = vector.shape_cast %56 : vector<1x16x16xf32> to vector<16x16xf32>
    %58 = vector.broadcast %31 : f32 to vector<16x16xf32>
    %59 = arith.mulf %57, %58 : vector<16x16xf32>
    %60 = arith.truncf %59 : vector<16x16xf32> to vector<16x16xbf16>
    %61 = arith.truncf %55 : vector<16x16xf32> to vector<16x16xbf16>
    %cst_30 = arith.constant dense<0.000000e+00> : vector<16x16xf32>
    %62 = tpu.matmul %61, %60, %cst_30 {dimension_numbers = #tpu.dot_dimension_numbers<[1], [0], [0], [1], [0, 0, 1, 1], [], []>} : vector<16x16xbf16>, vector<16x16xbf16>, vector<16x16xf32> -> vector<16x16xf32>
    %63 = arith.addf %54, %62 : vector<16x16xf32>
    %c5 = arith.constant 5 : index
    %c0_31 = arith.constant 0 : index
    %64 = vector.load %arg11[%c5, %c0_31] : memref<32x16xf32, #tpu.memory_space<vmem>>, vector<16x16xf32>
    %c1_i32 = arith.constant 1 : i32
    %65 = vector.broadcast %c1_i32 : i32 to vector<16x1xi32>
    %66 = arith.addi %0, %65 : vector<16x1xi32>
    %c0_i32_32 = arith.constant 0 : i32
    %67 = vector.broadcast %c0_i32_32 : i32 to vector<16x1xi32>
    %68 = arith.cmpi sge, %66, %67 : vector<16x1xi32>
    %c1_i32_33 = arith.constant 1 : i32
    %69 = vector.broadcast %c1_i32_33 : i32 to vector<16x1xi32>
    %70 = arith.addi %0, %69 : vector<16x1xi32>
    %c4_i32_34 = arith.constant 4 : i32
    %71 = vector.broadcast %c4_i32_34 : i32 to vector<16x1xi32>
    %72 = arith.cmpi slt, %70, %71 : vector<16x1xi32>
    %73 = arith.andi %68, %72 : vector<16x1xi1>
    %cst_35 = arith.constant 0.000000e+00 : f32
    %74 = vector.shape_cast %73 : vector<16x1xi1> to vector<16x1xi1>
    %75 = vector.broadcast %74 : vector<16x1xi1> to vector<16x16xi1>
    %76 = vector.broadcast %cst_35 : f32 to vector<16x16xf32>
    %77 = arith.select %75, %64, %76 : vector<16x16xi1>, vector<16x16xf32>
    %c2 = arith.constant 2 : index
    %c0_36 = arith.constant 0 : index
    %c0_37 = arith.constant 0 : index
    %78 = vector.load %arg6[%c2, %c0_36, %c0_37] : memref<9x16x16xf32, #tpu.memory_space<vmem>>, vector<1x16x16xf32>
    %79 = vector.shape_cast %78 : vector<1x16x16xf32> to vector<16x16xf32>
    %80 = vector.broadcast %31 : f32 to vector<16x16xf32>
    %81 = arith.mulf %79, %80 : vector<16x16xf32>
    %82 = arith.truncf %81 : vector<16x16xf32> to vector<16x16xbf16>
    %83 = arith.truncf %77 : vector<16x16xf32> to vector<16x16xbf16>
    %cst_38 = arith.constant dense<0.000000e+00> : vector<16x16xf32>
    %84 = tpu.matmul %83, %82, %cst_38 {dimension_numbers = #tpu.dot_dimension_numbers<[1], [0], [0], [1], [0, 0, 1, 1], [], []>} : vector<16x16xbf16>, vector<16x16xbf16>, vector<16x16xf32> -> vector<16x16xf32>
    %85 = arith.addf %63, %84 : vector<16x16xf32>
    %c7 = arith.constant 7 : index
    %c0_39 = arith.constant 0 : index
    %86 = vector.load %arg11[%c7, %c0_39] : memref<32x16xf32, #tpu.memory_space<vmem>>, vector<16x16xf32>
    %c-1_i32_40 = arith.constant -1 : i32
    %87 = vector.broadcast %c-1_i32_40 : i32 to vector<16x1xi32>
    %88 = arith.addi %0, %87 : vector<16x1xi32>
    %c0_i32_41 = arith.constant 0 : i32
    %89 = vector.broadcast %c0_i32_41 : i32 to vector<16x1xi32>
    %90 = arith.cmpi sge, %88, %89 : vector<16x1xi32>
    %c-1_i32_42 = arith.constant -1 : i32
    %91 = vector.broadcast %c-1_i32_42 : i32 to vector<16x1xi32>
    %92 = arith.addi %0, %91 : vector<16x1xi32>
    %c4_i32_43 = arith.constant 4 : i32
    %93 = vector.broadcast %c4_i32_43 : i32 to vector<16x1xi32>
    %94 = arith.cmpi slt, %92, %93 : vector<16x1xi32>
    %95 = arith.andi %90, %94 : vector<16x1xi1>
    %cst_44 = arith.constant 0.000000e+00 : f32
    %96 = vector.shape_cast %95 : vector<16x1xi1> to vector<16x1xi1>
    %97 = vector.broadcast %96 : vector<16x1xi1> to vector<16x16xi1>
    %98 = vector.broadcast %cst_44 : f32 to vector<16x16xf32>
    %99 = arith.select %97, %86, %98 : vector<16x16xi1>, vector<16x16xf32>
    %c3_45 = arith.constant 3 : index
    %c0_46 = arith.constant 0 : index
    %c0_47 = arith.constant 0 : index
    %100 = vector.load %arg6[%c3_45, %c0_46, %c0_47] : memref<9x16x16xf32, #tpu.memory_space<vmem>>, vector<1x16x16xf32>
    %101 = vector.shape_cast %100 : vector<1x16x16xf32> to vector<16x16xf32>
    %102 = vector.broadcast %31 : f32 to vector<16x16xf32>
    %103 = arith.mulf %101, %102 : vector<16x16xf32>
    %104 = arith.truncf %103 : vector<16x16xf32> to vector<16x16xbf16>
    %105 = arith.truncf %99 : vector<16x16xf32> to vector<16x16xbf16>
    %cst_48 = arith.constant dense<0.000000e+00> : vector<16x16xf32>
    %106 = tpu.matmul %105, %104, %cst_48 {dimension_numbers = #tpu.dot_dimension_numbers<[1], [0], [0], [1], [0, 0, 1, 1], [], []>} : vector<16x16xbf16>, vector<16x16xbf16>, vector<16x16xf32> -> vector<16x16xf32>
    %107 = arith.addf %85, %106 : vector<16x16xf32>
    %c8_49 = arith.constant 8 : index
    %c0_50 = arith.constant 0 : index
    %108 = vector.load %arg11[%c8_49, %c0_50] : memref<32x16xf32, #tpu.memory_space<vmem>>, vector<16x16xf32>
    %c4_51 = arith.constant 4 : index
    %c0_52 = arith.constant 0 : index
    %c0_53 = arith.constant 0 : index
    %109 = vector.load %arg6[%c4_51, %c0_52, %c0_53] : memref<9x16x16xf32, #tpu.memory_space<vmem>>, vector<1x16x16xf32>
    %110 = vector.shape_cast %109 : vector<1x16x16xf32> to vector<16x16xf32>
    %111 = vector.broadcast %31 : f32 to vector<16x16xf32>
    %112 = arith.mulf %110, %111 : vector<16x16xf32>
    %113 = arith.truncf %112 : vector<16x16xf32> to vector<16x16xbf16>
    %114 = arith.truncf %108 : vector<16x16xf32> to vector<16x16xbf16>
    %cst_54 = arith.constant dense<0.000000e+00> : vector<16x16xf32>
    %115 = tpu.matmul %114, %113, %cst_54 {dimension_numbers = #tpu.dot_dimension_numbers<[1], [0], [0], [1], [0, 0, 1, 1], [], []>} : vector<16x16xbf16>, vector<16x16xbf16>, vector<16x16xf32> -> vector<16x16xf32>
    %116 = arith.addf %107, %115 : vector<16x16xf32>
    %c9 = arith.constant 9 : index
    %c0_55 = arith.constant 0 : index
    %117 = vector.load %arg11[%c9, %c0_55] : memref<32x16xf32, #tpu.memory_space<vmem>>, vector<16x16xf32>
    %c1_i32_56 = arith.constant 1 : i32
    %118 = vector.broadcast %c1_i32_56 : i32 to vector<16x1xi32>
    %119 = arith.addi %0, %118 : vector<16x1xi32>
    %c0_i32_57 = arith.constant 0 : i32
    %120 = vector.broadcast %c0_i32_57 : i32 to vector<16x1xi32>
    %121 = arith.cmpi sge, %119, %120 : vector<16x1xi32>
    %c1_i32_58 = arith.constant 1 : i32
    %122 = vector.broadcast %c1_i32_58 : i32 to vector<16x1xi32>
    %123 = arith.addi %0, %122 : vector<16x1xi32>
    %c4_i32_59 = arith.constant 4 : i32
    %124 = vector.broadcast %c4_i32_59 : i32 to vector<16x1xi32>
    %125 = arith.cmpi slt, %123, %124 : vector<16x1xi32>
    %126 = arith.andi %121, %125 : vector<16x1xi1>
    %cst_60 = arith.constant 0.000000e+00 : f32
    %127 = vector.shape_cast %126 : vector<16x1xi1> to vector<16x1xi1>
    %128 = vector.broadcast %127 : vector<16x1xi1> to vector<16x16xi1>
    %129 = vector.broadcast %cst_60 : f32 to vector<16x16xf32>
    %130 = arith.select %128, %117, %129 : vector<16x16xi1>, vector<16x16xf32>
    %c5_61 = arith.constant 5 : index
    %c0_62 = arith.constant 0 : index
    %c0_63 = arith.constant 0 : index
    %131 = vector.load %arg6[%c5_61, %c0_62, %c0_63] : memref<9x16x16xf32, #tpu.memory_space<vmem>>, vector<1x16x16xf32>
    %132 = vector.shape_cast %131 : vector<1x16x16xf32> to vector<16x16xf32>
    %133 = vector.broadcast %31 : f32 to vector<16x16xf32>
    %134 = arith.mulf %132, %133 : vector<16x16xf32>
    %135 = arith.truncf %134 : vector<16x16xf32> to vector<16x16xbf16>
    %136 = arith.truncf %130 : vector<16x16xf32> to vector<16x16xbf16>
    %cst_64 = arith.constant dense<0.000000e+00> : vector<16x16xf32>
    %137 = tpu.matmul %136, %135, %cst_64 {dimension_numbers = #tpu.dot_dimension_numbers<[1], [0], [0], [1], [0, 0, 1, 1], [], []>} : vector<16x16xbf16>, vector<16x16xbf16>, vector<16x16xf32> -> vector<16x16xf32>
    %138 = arith.addf %116, %137 : vector<16x16xf32>
    %c11 = arith.constant 11 : index
    %c0_65 = arith.constant 0 : index
    %139 = vector.load %arg11[%c11, %c0_65] : memref<32x16xf32, #tpu.memory_space<vmem>>, vector<16x16xf32>
    %c-1_i32_66 = arith.constant -1 : i32
    %140 = vector.broadcast %c-1_i32_66 : i32 to vector<16x1xi32>
    %141 = arith.addi %0, %140 : vector<16x1xi32>
    %c0_i32_67 = arith.constant 0 : i32
    %142 = vector.broadcast %c0_i32_67 : i32 to vector<16x1xi32>
    %143 = arith.cmpi sge, %141, %142 : vector<16x1xi32>
    %c-1_i32_68 = arith.constant -1 : i32
    %144 = vector.broadcast %c-1_i32_68 : i32 to vector<16x1xi32>
    %145 = arith.addi %0, %144 : vector<16x1xi32>
    %c4_i32_69 = arith.constant 4 : i32
    %146 = vector.broadcast %c4_i32_69 : i32 to vector<16x1xi32>
    %147 = arith.cmpi slt, %145, %146 : vector<16x1xi32>
    %148 = arith.andi %143, %147 : vector<16x1xi1>
    %cst_70 = arith.constant 0.000000e+00 : f32
    %149 = vector.shape_cast %148 : vector<16x1xi1> to vector<16x1xi1>
    %150 = vector.broadcast %149 : vector<16x1xi1> to vector<16x16xi1>
    %151 = vector.broadcast %cst_70 : f32 to vector<16x16xf32>
    %152 = arith.select %150, %139, %151 : vector<16x16xi1>, vector<16x16xf32>
    %c6 = arith.constant 6 : index
    %c0_71 = arith.constant 0 : index
    %c0_72 = arith.constant 0 : index
    %153 = vector.load %arg6[%c6, %c0_71, %c0_72] : memref<9x16x16xf32, #tpu.memory_space<vmem>>, vector<1x16x16xf32>
    %154 = vector.shape_cast %153 : vector<1x16x16xf32> to vector<16x16xf32>
    %155 = vector.broadcast %31 : f32 to vector<16x16xf32>
    %156 = arith.mulf %154, %155 : vector<16x16xf32>
    %157 = arith.truncf %156 : vector<16x16xf32> to vector<16x16xbf16>
    %158 = arith.truncf %152 : vector<16x16xf32> to vector<16x16xbf16>
    %cst_73 = arith.constant dense<0.000000e+00> : vector<16x16xf32>
    %159 = tpu.matmul %158, %157, %cst_73 {dimension_numbers = #tpu.dot_dimension_numbers<[1], [0], [0], [1], [0, 0, 1, 1], [], []>} : vector<16x16xbf16>, vector<16x16xbf16>, vector<16x16xf32> -> vector<16x16xf32>
    %160 = arith.addf %138, %159 : vector<16x16xf32>
    %c12 = arith.constant 12 : index
    %c0_74 = arith.constant 0 : index
    %161 = vector.load %arg11[%c12, %c0_74] : memref<32x16xf32, #tpu.memory_space<vmem>>, vector<16x16xf32>
    %c7_75 = arith.constant 7 : index
    %c0_76 = arith.constant 0 : index
    %c0_77 = arith.constant 0 : index
    %162 = vector.load %arg6[%c7_75, %c0_76, %c0_77] : memref<9x16x16xf32, #tpu.memory_space<vmem>>, vector<1x16x16xf32>
    %163 = vector.shape_cast %162 : vector<1x16x16xf32> to vector<16x16xf32>
    %164 = vector.broadcast %31 : f32 to vector<16x16xf32>
    %165 = arith.mulf %163, %164 : vector<16x16xf32>
    %166 = arith.truncf %165 : vector<16x16xf32> to vector<16x16xbf16>
    %167 = arith.truncf %161 : vector<16x16xf32> to vector<16x16xbf16>
    %cst_78 = arith.constant dense<0.000000e+00> : vector<16x16xf32>
    %168 = tpu.matmul %167, %166, %cst_78 {dimension_numbers = #tpu.dot_dimension_numbers<[1], [0], [0], [1], [0, 0, 1, 1], [], []>} : vector<16x16xbf16>, vector<16x16xbf16>, vector<16x16xf32> -> vector<16x16xf32>
    %169 = arith.addf %160, %168 : vector<16x16xf32>
    %c13 = arith.constant 13 : index
    %c0_79 = arith.constant 0 : index
    %170 = vector.load %arg11[%c13, %c0_79] : memref<32x16xf32, #tpu.memory_space<vmem>>, vector<16x16xf32>
    %c1_i32_80 = arith.constant 1 : i32
    %171 = vector.broadcast %c1_i32_80 : i32 to vector<16x1xi32>
    %172 = arith.addi %0, %171 : vector<16x1xi32>
    %c0_i32_81 = arith.constant 0 : i32
    %173 = vector.broadcast %c0_i32_81 : i32 to vector<16x1xi32>
    %174 = arith.cmpi sge, %172, %173 : vector<16x1xi32>
    %c1_i32_82 = arith.constant 1 : i32
    %175 = vector.broadcast %c1_i32_82 : i32 to vector<16x1xi32>
    %176 = arith.addi %0, %175 : vector<16x1xi32>
    %c4_i32_83 = arith.constant 4 : i32
    %177 = vector.broadcast %c4_i32_83 : i32 to vector<16x1xi32>
    %178 = arith.cmpi slt, %176, %177 : vector<16x1xi32>
    %179 = arith.andi %174, %178 : vector<16x1xi1>
    %cst_84 = arith.constant 0.000000e+00 : f32
    %180 = vector.shape_cast %179 : vector<16x1xi1> to vector<16x1xi1>
    %181 = vector.broadcast %180 : vector<16x1xi1> to vector<16x16xi1>
    %182 = vector.broadcast %cst_84 : f32 to vector<16x16xf32>
    %183 = arith.select %181, %170, %182 : vector<16x16xi1>, vector<16x16xf32>
    %c8_85 = arith.constant 8 : index
    %c0_86 = arith.constant 0 : index
    %c0_87 = arith.constant 0 : index
    %184 = vector.load %arg6[%c8_85, %c0_86, %c0_87] : memref<9x16x16xf32, #tpu.memory_space<vmem>>, vector<1x16x16xf32>
    %185 = vector.shape_cast %184 : vector<1x16x16xf32> to vector<16x16xf32>
    %186 = vector.broadcast %31 : f32 to vector<16x16xf32>
    %187 = arith.mulf %185, %186 : vector<16x16xf32>
    %188 = arith.truncf %187 : vector<16x16xf32> to vector<16x16xbf16>
    %189 = arith.truncf %183 : vector<16x16xf32> to vector<16x16xbf16>
    %cst_88 = arith.constant dense<0.000000e+00> : vector<16x16xf32>
    %190 = tpu.matmul %189, %188, %cst_88 {dimension_numbers = #tpu.dot_dimension_numbers<[1], [0], [0], [1], [0, 0, 1, 1], [], []>} : vector<16x16xbf16>, vector<16x16xbf16>, vector<16x16xf32> -> vector<16x16xf32>
    %191 = arith.addf %169, %190 : vector<16x16xf32>
    %c0_89 = arith.constant 0 : index
    %c0_90 = arith.constant 0 : index
    %192 = vector.load %arg7[%c0_89, %c0_90] : memref<1x16xf32, #tpu.memory_space<vmem>>, vector<1x16xf32>
    %193 = vector.broadcast %192 : vector<1x16xf32> to vector<16x16xf32>
    %194 = arith.addf %191, %193 : vector<16x16xf32>
    %195 = arith.mulf %194, %194 : vector<16x16xf32>
    %cst_91 = arith.constant dense<0.000000e+00> : vector<16xf32>
    %196 = vector.multi_reduction <add>, %195, %cst_91 [1] : vector<16x16xf32> to vector<16xf32>
    %197 = vector.shape_cast %196 : vector<16xf32> to vector<16x1xf32>
    %cst_92 = arith.constant 1.600000e+01 : f32
    %198 = vector.broadcast %cst_92 : f32 to vector<16x1xf32>
    %199 = arith.divf %197, %198 : vector<16x1xf32>
    %cst_93 = arith.constant 9.99999993E-9 : f32
    %200 = vector.broadcast %cst_93 : f32 to vector<16x1xf32>
    %201 = arith.addf %199, %200 : vector<16x1xf32>
    %202 = math.rsqrt %201 : vector<16x1xf32>
    %203 = vector.broadcast %202 : vector<16x1xf32> to vector<16x16xf32>
    %204 = arith.mulf %194, %203 : vector<16x16xf32>
    %cst_94 = arith.constant 0.000000e+00 : f32
    %205 = vector.broadcast %cst_94 : f32 to vector<16x16xf32>
    %206 = arith.cmpf oge, %204, %205 : vector<16x16xf32>
    %cst_95 = arith.constant 2.000000e-01 : f32
    %207 = vector.broadcast %cst_95 : f32 to vector<16x16xf32>
    %208 = arith.mulf %207, %204 : vector<16x16xf32>
    %209 = arith.select %206, %204, %208 : vector<16x16xi1>, vector<16x16xf32>
    %c8_96 = arith.constant 8 : index
    %c0_97 = arith.constant 0 : index
    %210 = vector.load %arg11[%c8_96, %c0_97] : memref<32x16xf32, #tpu.memory_space<vmem>>, vector<16x16xf32>
    tpu.vector_store %arg11[%c8_96, %c0_97], %209 {strides = array<i32>} : memref<32x16xf32, #tpu.memory_space<vmem>>, vector<16x16xf32>,
    %c2_98 = arith.constant 2 : index
    %211 = memref.load %arg1[%c2_98] : memref<4xf32, #tpu.memory_space<smem>>
    %cst_99 = arith.constant 0.000000e+00 : f32
    %212 = vector.broadcast %cst_99 : f32 to vector<16x3xf32>
    %c3_100 = arith.constant 3 : index
    %c0_101 = arith.constant 0 : index
    %213 = vector.load %arg11[%c3_100, %c0_101] : memref<32x16xf32, #tpu.memory_space<vmem>>, vector<16x16xf32>
    %c-1_i32_102 = arith.constant -1 : i32
    %214 = vector.broadcast %c-1_i32_102 : i32 to vector<16x1xi32>
    %215 = arith.addi %0, %214 : vector<16x1xi32>
    %c0_i32_103 = arith.constant 0 : i32
    %216 = vector.broadcast %c0_i32_103 : i32 to vector<16x1xi32>
    %217 = arith.cmpi sge, %215, %216 : vector<16x1xi32>
    %c-1_i32_104 = arith.constant -1 : i32
    %218 = vector.broadcast %c-1_i32_104 : i32 to vector<16x1xi32>
    %219 = arith.addi %0, %218 : vector<16x1xi32>
    %c4_i32_105 = arith.constant 4 : i32
    %220 = vector.broadcast %c4_i32_105 : i32 to vector<16x1xi32>
    %221 = arith.cmpi slt, %219, %220 : vector<16x1xi32>
    %222 = arith.andi %217, %221 : vector<16x1xi1>
    %cst_106 = arith.constant 0.000000e+00 : f32
    %223 = vector.shape_cast %222 : vector<16x1xi1> to vector<16x1xi1>
    %224 = vector.broadcast %223 : vector<16x1xi1> to vector<16x16xi1>
    %225 = vector.broadcast %cst_106 : f32 to vector<16x16xf32>
    %226 = arith.select %224, %213, %225 : vector<16x16xi1>, vector<16x16xf32>
    %c0_107 = arith.constant 0 : index
    %c0_108 = arith.constant 0 : index
    %c0_109 = arith.constant 0 : index
    %227 = vector.load %arg8[%c0_107, %c0_108, %c0_109] : memref<9x16x3xf32, #tpu.memory_space<vmem>>, vector<1x16x3xf32>
    %228 = vector.shape_cast %227 : vector<1x16x3xf32> to vector<16x3xf32>
    %229 = vector.broadcast %211 : f32 to vector<16x3xf32>
    %230 = arith.mulf %228, %229 : vector<16x3xf32>
    %231 = arith.truncf %230 : vector<16x3xf32> to vector<16x3xbf16>
    %232 = arith.truncf %226 : vector<16x16xf32> to vector<16x16xbf16>
    %cst_110 = arith.constant dense<0.000000e+00> : vector<16x3xf32>
    %233 = tpu.matmul %232, %231, %cst_110 {dimension_numbers = #tpu.dot_dimension_numbers<[1], [0], [0], [1], [0, 0, 1, 1], [], []>} : vector<16x16xbf16>, vector<16x3xbf16>, vector<16x3xf32> -> vector<16x3xf32>
    %234 = arith.addf %212, %233 : vector<16x3xf32>
    %c4_111 = arith.constant 4 : index
    %c0_112 = arith.constant 0 : index
    %235 = vector.load %arg11[%c4_111, %c0_112] : memref<32x16xf32, #tpu.memory_space<vmem>>, vector<16x16xf32>
    %c1_113 = arith.constant 1 : index
    %c0_114 = arith.constant 0 : index
    %c0_115 = arith.constant 0 : index
    %236 = vector.load %arg8[%c1_113, %c0_114, %c0_115] : memref<9x16x3xf32, #tpu.memory_space<vmem>>, vector<1x16x3xf32>
    %237 = vector.shape_cast %236 : vector<1x16x3xf32> to vector<16x3xf32>
    %238 = vector.broadcast %211 : f32 to vector<16x3xf32>
    %239 = arith.mulf %237, %238 : vector<16x3xf32>
    %240 = arith.truncf %239 : vector<16x3xf32> to vector<16x3xbf16>
    %241 = arith.truncf %235 : vector<16x16xf32> to vector<16x16xbf16>
    %cst_116 = arith.constant dense<0.000000e+00> : vector<16x3xf32>
    %242 = tpu.matmul %241, %240, %cst_116 {dimension_numbers = #tpu.dot_dimension_numbers<[1], [0], [0], [1], [0, 0, 1, 1], [], []>} : vector<16x16xbf16>, vector<16x3xbf16>, vector<16x3xf32> -> vector<16x3xf32>
    %243 = arith.addf %234, %242 : vector<16x3xf32>
    %c5_117 = arith.constant 5 : index
    %c0_118 = arith.constant 0 : index
    %244 = vector.load %arg11[%c5_117, %c0_118] : memref<32x16xf32, #tpu.memory_space<vmem>>, vector<16x16xf32>
    %c1_i32_119 = arith.constant 1 : i32
    %245 = vector.broadcast %c1_i32_119 : i32 to vector<16x1xi32>
    %246 = arith.addi %0, %245 : vector<16x1xi32>
    %c0_i32_120 = arith.constant 0 : i32
    %247 = vector.broadcast %c0_i32_120 : i32 to vector<16x1xi32>
    %248 = arith.cmpi sge, %246, %247 : vector<16x1xi32>
    %c1_i32_121 = arith.constant 1 : i32
    %249 = vector.broadcast %c1_i32_121 : i32 to vector<16x1xi32>
    %250 = arith.addi %0, %249 : vector<16x1xi32>
    %c4_i32_122 = arith.constant 4 : i32
    %251 = vector.broadcast %c4_i32_122 : i32 to vector<16x1xi32>
    %252 = arith.cmpi slt, %250, %251 : vector<16x1xi32>
    %253 = arith.andi %248, %252 : vector<16x1xi1>
    %cst_123 = arith.constant 0.000000e+00 : f32
    %254 = vector.shape_cast %253 : vector<16x1xi1> to vector<16x1xi1>
    %255 = vector.broadcast %254 : vector<16x1xi1> to vector<16x16xi1>
    %256 = vector.broadcast %cst_123 : f32 to vector<16x16xf32>
    %257 = arith.select %255, %244, %256 : vector<16x16xi1>, vector<16x16xf32>
    %c2_124 = arith.constant 2 : index
    %c0_125 = arith.constant 0 : index
    %c0_126 = arith.constant 0 : index
    %258 = vector.load %arg8[%c2_124, %c0_125, %c0_126] : memref<9x16x3xf32, #tpu.memory_space<vmem>>, vector<1x16x3xf32>
    %259 = vector.shape_cast %258 : vector<1x16x3xf32> to vector<16x3xf32>
    %260 = vector.broadcast %211 : f32 to vector<16x3xf32>
    %261 = arith.mulf %259, %260 : vector<16x3xf32>
    %262 = arith.truncf %261 : vector<16x3xf32> to vector<16x3xbf16>
    %263 = arith.truncf %257 : vector<16x16xf32> to vector<16x16xbf16>
    %cst_127 = arith.constant dense<0.000000e+00> : vector<16x3xf32>
    %264 = tpu.matmul %263, %262, %cst_127 {dimension_numbers = #tpu.dot_dimension_numbers<[1], [0], [0], [1], [0, 0, 1, 1], [], []>} : vector<16x16xbf16>, vector<16x3xbf16>, vector<16x3xf32> -> vector<16x3xf32>
    %265 = arith.addf %243, %264 : vector<16x3xf32>
    %c7_128 = arith.constant 7 : index
    %c0_129 = arith.constant 0 : index
    %266 = vector.load %arg11[%c7_128, %c0_129] : memref<32x16xf32, #tpu.memory_space<vmem>>, vector<16x16xf32>
    %c-1_i32_130 = arith.constant -1 : i32
    %267 = vector.broadcast %c-1_i32_130 : i32 to vector<16x1xi32>
    %268 = arith.addi %0, %267 : vector<16x1xi32>
    %c0_i32_131 = arith.constant 0 : i32
    %269 = vector.broadcast %c0_i32_131 : i32 to vector<16x1xi32>
    %270 = arith.cmpi sge, %268, %269 : vector<16x1xi32>
    %c-1_i32_132 = arith.constant -1 : i32
    %271 = vector.broadcast %c-1_i32_132 : i32 to vector<16x1xi32>
    %272 = arith.addi %0, %271 : vector<16x1xi32>
    %c4_i32_133 = arith.constant 4 : i32
    %273 = vector.broadcast %c4_i32_133 : i32 to vector<16x1xi32>
    %274 = arith.cmpi slt, %272, %273 : vector<16x1xi32>
    %275 = arith.andi %270, %274 : vector<16x1xi1>
    %cst_134 = arith.constant 0.000000e+00 : f32
    %276 = vector.shape_cast %275 : vector<16x1xi1> to vector<16x1xi1>
    %277 = vector.broadcast %276 : vector<16x1xi1> to vector<16x16xi1>
    %278 = vector.broadcast %cst_134 : f32 to vector<16x16xf32>
    %279 = arith.select %277, %266, %278 : vector<16x16xi1>, vector<16x16xf32>
    %c3_135 = arith.constant 3 : index
    %c0_136 = arith.constant 0 : index
    %c0_137 = arith.constant 0 : index
    %280 = vector.load %arg8[%c3_135, %c0_136, %c0_137] : memref<9x16x3xf32, #tpu.memory_space<vmem>>, vector<1x16x3xf32>
    %281 = vector.shape_cast %280 : vector<1x16x3xf32> to vector<16x3xf32>
    %282 = vector.broadcast %211 : f32 to vector<16x3xf32>
    %283 = arith.mulf %281, %282 : vector<16x3xf32>
    %284 = arith.truncf %283 : vector<16x3xf32> to vector<16x3xbf16>
    %285 = arith.truncf %279 : vector<16x16xf32> to vector<16x16xbf16>
    %cst_138 = arith.constant dense<0.000000e+00> : vector<16x3xf32>
    %286 = tpu.matmul %285, %284, %cst_138 {dimension_numbers = #tpu.dot_dimension_numbers<[1], [0], [0], [1], [0, 0, 1, 1], [], []>} : vector<16x16xbf16>, vector<16x3xbf16>, vector<16x3xf32> -> vector<16x3xf32>
    %287 = arith.addf %265, %286 : vector<16x3xf32>
    %c8_139 = arith.constant 8 : index
    %c0_140 = arith.constant 0 : index
    %288 = vector.load %arg11[%c8_139, %c0_140] : memref<32x16xf32, #tpu.memory_space<vmem>>, vector<16x16xf32>
    %c4_141 = arith.constant 4 : index
    %c0_142 = arith.constant 0 : index
    %c0_143 = arith.constant 0 : index
    %289 = vector.load %arg8[%c4_141, %c0_142, %c0_143] : memref<9x16x3xf32, #tpu.memory_space<vmem>>, vector<1x16x3xf32>
    %290 = vector.shape_cast %289 : vector<1x16x3xf32> to vector<16x3xf32>
    %291 = vector.broadcast %211 : f32 to vector<16x3xf32>
    %292 = arith.mulf %290, %291 : vector<16x3xf32>
    %293 = arith.truncf %292 : vector<16x3xf32> to vector<16x3xbf16>
    %294 = arith.truncf %288 : vector<16x16xf32> to vector<16x16xbf16>
    %cst_144 = arith.constant dense<0.000000e+00> : vector<16x3xf32>
    %295 = tpu.matmul %294, %293, %cst_144 {dimension_numbers = #tpu.dot_dimension_numbers<[1], [0], [0], [1], [0, 0, 1, 1], [], []>} : vector<16x16xbf16>, vector<16x3xbf16>, vector<16x3xf32> -> vector<16x3xf32>
    %296 = arith.addf %287, %295 : vector<16x3xf32>
    %c9_145 = arith.constant 9 : index
    %c0_146 = arith.constant 0 : index
    %297 = vector.load %arg11[%c9_145, %c0_146] : memref<32x16xf32, #tpu.memory_space<vmem>>, vector<16x16xf32>
    %c1_i32_147 = arith.constant 1 : i32
    %298 = vector.broadcast %c1_i32_147 : i32 to vector<16x1xi32>
    %299 = arith.addi %0, %298 : vector<16x1xi32>
    %c0_i32_148 = arith.constant 0 : i32
    %300 = vector.broadcast %c0_i32_148 : i32 to vector<16x1xi32>
    %301 = arith.cmpi sge, %299, %300 : vector<16x1xi32>
    %c1_i32_149 = arith.constant 1 : i32
    %302 = vector.broadcast %c1_i32_149 : i32 to vector<16x1xi32>
    %303 = arith.addi %0, %302 : vector<16x1xi32>
    %c4_i32_150 = arith.constant 4 : i32
    %304 = vector.broadcast %c4_i32_150 : i32 to vector<16x1xi32>
    %305 = arith.cmpi slt, %303, %304 : vector<16x1xi32>
    %306 = arith.andi %301, %305 : vector<16x1xi1>
    %cst_151 = arith.constant 0.000000e+00 : f32
    %307 = vector.shape_cast %306 : vector<16x1xi1> to vector<16x1xi1>
    %308 = vector.broadcast %307 : vector<16x1xi1> to vector<16x16xi1>
    %309 = vector.broadcast %cst_151 : f32 to vector<16x16xf32>
    %310 = arith.select %308, %297, %309 : vector<16x16xi1>, vector<16x16xf32>
    %c5_152 = arith.constant 5 : index
    %c0_153 = arith.constant 0 : index
    %c0_154 = arith.constant 0 : index
    %311 = vector.load %arg8[%c5_152, %c0_153, %c0_154] : memref<9x16x3xf32, #tpu.memory_space<vmem>>, vector<1x16x3xf32>
    %312 = vector.shape_cast %311 : vector<1x16x3xf32> to vector<16x3xf32>
    %313 = vector.broadcast %211 : f32 to vector<16x3xf32>
    %314 = arith.mulf %312, %313 : vector<16x3xf32>
    %315 = arith.truncf %314 : vector<16x3xf32> to vector<16x3xbf16>
    %316 = arith.truncf %310 : vector<16x16xf32> to vector<16x16xbf16>
    %cst_155 = arith.constant dense<0.000000e+00> : vector<16x3xf32>
    %317 = tpu.matmul %316, %315, %cst_155 {dimension_numbers = #tpu.dot_dimension_numbers<[1], [0], [0], [1], [0, 0, 1, 1], [], []>} : vector<16x16xbf16>, vector<16x3xbf16>, vector<16x3xf32> -> vector<16x3xf32>
    %318 = arith.addf %296, %317 : vector<16x3xf32>
    %c11_156 = arith.constant 11 : index
    %c0_157 = arith.constant 0 : index
    %319 = vector.load %arg11[%c11_156, %c0_157] : memref<32x16xf32, #tpu.memory_space<vmem>>, vector<16x16xf32>
    %c-1_i32_158 = arith.constant -1 : i32
    %320 = vector.broadcast %c-1_i32_158 : i32 to vector<16x1xi32>
    %321 = arith.addi %0, %320 : vector<16x1xi32>
    %c0_i32_159 = arith.constant 0 : i32
    %322 = vector.broadcast %c0_i32_159 : i32 to vector<16x1xi32>
    %323 = arith.cmpi sge, %321, %322 : vector<16x1xi32>
    %c-1_i32_160 = arith.constant -1 : i32
    %324 = vector.broadcast %c-1_i32_160 : i32 to vector<16x1xi32>
    %325 = arith.addi %0, %324 : vector<16x1xi32>
    %c4_i32_161 = arith.constant 4 : i32
    %326 = vector.broadcast %c4_i32_161 : i32 to vector<16x1xi32>
    %327 = arith.cmpi slt, %325, %326 : vector<16x1xi32>
    %328 = arith.andi %323, %327 : vector<16x1xi1>
    %cst_162 = arith.constant 0.000000e+00 : f32
    %329 = vector.shape_cast %328 : vector<16x1xi1> to vector<16x1xi1>
    %330 = vector.broadcast %329 : vector<16x1xi1> to vector<16x16xi1>
    %331 = vector.broadcast %cst_162 : f32 to vector<16x16xf32>
    %332 = arith.select %330, %319, %331 : vector<16x16xi1>, vector<16x16xf32>
    %c6_163 = arith.constant 6 : index
    %c0_164 = arith.constant 0 : index
    %c0_165 = arith.constant 0 : index
    %333 = vector.load %arg8[%c6_163, %c0_164, %c0_165] : memref<9x16x3xf32, #tpu.memory_space<vmem>>, vector<1x16x3xf32>
    %334 = vector.shape_cast %333 : vector<1x16x3xf32> to vector<16x3xf32>
    %335 = vector.broadcast %211 : f32 to vector<16x3xf32>
    %336 = arith.mulf %334, %335 : vector<16x3xf32>
    %337 = arith.truncf %336 : vector<16x3xf32> to vector<16x3xbf16>
    %338 = arith.truncf %332 : vector<16x16xf32> to vector<16x16xbf16>
    %cst_166 = arith.constant dense<0.000000e+00> : vector<16x3xf32>
    %339 = tpu.matmul %338, %337, %cst_166 {dimension_numbers = #tpu.dot_dimension_numbers<[1], [0], [0], [1], [0, 0, 1, 1], [], []>} : vector<16x16xbf16>, vector<16x3xbf16>, vector<16x3xf32> -> vector<16x3xf32>
    %340 = arith.addf %318, %339 : vector<16x3xf32>
    %c12_167 = arith.constant 12 : index
    %c0_168 = arith.constant 0 : index
    %341 = vector.load %arg11[%c12_167, %c0_168] : memref<32x16xf32, #tpu.memory_space<vmem>>, vector<16x16xf32>
    %c7_169 = arith.constant 7 : index
    %c0_170 = arith.constant 0 : index
    %c0_171 = arith.constant 0 : index
    %342 = vector.load %arg8[%c7_169, %c0_170, %c0_171] : memref<9x16x3xf32, #tpu.memory_space<vmem>>, vector<1x16x3xf32>
    %343 = vector.shape_cast %342 : vector<1x16x3xf32> to vector<16x3xf32>
    %344 = vector.broadcast %211 : f32 to vector<16x3xf32>
    %345 = arith.mulf %343, %344 : vector<16x3xf32>
    %346 = arith.truncf %345 : vector<16x3xf32> to vector<16x3xbf16>
    %347 = arith.truncf %341 : vector<16x16xf32> to vector<16x16xbf16>
    %cst_172 = arith.constant dense<0.000000e+00> : vector<16x3xf32>
    %348 = tpu.matmul %347, %346, %cst_172 {dimension_numbers = #tpu.dot_dimension_numbers<[1], [0], [0], [1], [0, 0, 1, 1], [], []>} : vector<16x16xbf16>, vector<16x3xbf16>, vector<16x3xf32> -> vector<16x3xf32>
    %349 = arith.addf %340, %348 : vector<16x3xf32>
    %c13_173 = arith.constant 13 : index
    %c0_174 = arith.constant 0 : index
    %350 = vector.load %arg11[%c13_173, %c0_174] : memref<32x16xf32, #tpu.memory_space<vmem>>, vector<16x16xf32>
    %c1_i32_175 = arith.constant 1 : i32
    %351 = vector.broadcast %c1_i32_175 : i32 to vector<16x1xi32>
    %352 = arith.addi %0, %351 : vector<16x1xi32>
    %c0_i32_176 = arith.constant 0 : i32
    %353 = vector.broadcast %c0_i32_176 : i32 to vector<16x1xi32>
    %354 = arith.cmpi sge, %352, %353 : vector<16x1xi32>
    %c1_i32_177 = arith.constant 1 : i32
    %355 = vector.broadcast %c1_i32_177 : i32 to vector<16x1xi32>
    %356 = arith.addi %0, %355 : vector<16x1xi32>
    %c4_i32_178 = arith.constant 4 : i32
    %357 = vector.broadcast %c4_i32_178 : i32 to vector<16x1xi32>
    %358 = arith.cmpi slt, %356, %357 : vector<16x1xi32>
    %359 = arith.andi %354, %358 : vector<16x1xi1>
    %cst_179 = arith.constant 0.000000e+00 : f32
    %360 = vector.shape_cast %359 : vector<16x1xi1> to vector<16x1xi1>
    %361 = vector.broadcast %360 : vector<16x1xi1> to vector<16x16xi1>
    %362 = vector.broadcast %cst_179 : f32 to vector<16x16xf32>
    %363 = arith.select %361, %350, %362 : vector<16x16xi1>, vector<16x16xf32>
    %c8_180 = arith.constant 8 : index
    %c0_181 = arith.constant 0 : index
    %c0_182 = arith.constant 0 : index
    %364 = vector.load %arg8[%c8_180, %c0_181, %c0_182] : memref<9x16x3xf32, #tpu.memory_space<vmem>>, vector<1x16x3xf32>
    %365 = vector.shape_cast %364 : vector<1x16x3xf32> to vector<16x3xf32>
    %366 = vector.broadcast %211 : f32 to vector<16x3xf32>
    %367 = arith.mulf %365, %366 : vector<16x3xf32>
    %368 = arith.truncf %367 : vector<16x3xf32> to vector<16x3xbf16>
    %369 = arith.truncf %363 : vector<16x16xf32> to vector<16x16xbf16>
    %cst_183 = arith.constant dense<0.000000e+00> : vector<16x3xf32>
    %370 = tpu.matmul %369, %368, %cst_183 {dimension_numbers = #tpu.dot_dimension_numbers<[1], [0], [0], [1], [0, 0, 1, 1], [], []>} : vector<16x16xbf16>, vector<16x3xbf16>, vector<16x3xf32> -> vector<16x3xf32>
    %371 = arith.addf %349, %370 : vector<16x3xf32>
    %c0_184 = arith.constant 0 : index
    %c0_185 = arith.constant 0 : index
    %372 = vector.load %arg9[%c0_184, %c0_185] : memref<1x3xf32, #tpu.memory_space<vmem>>, vector<1x3xf32>
    %373 = vector.broadcast %372 : vector<1x3xf32> to vector<16x3xf32>
    %374 = arith.addf %371, %373 : vector<16x3xf32>
    %c0_186 = arith.constant 0 : index
    %c0_187 = arith.constant 0 : index
    %c0_188 = arith.constant 0 : index
    %375 = vector.load %arg10[%c0_186, %c0_187, %c0_188] : memref<1x16x3xf32, #tpu.memory_space<vmem>>, vector<1x16x3xf32>
    %376 = vector.shape_cast %375 : vector<1x16x3xf32> to vector<16x3xf32>
    %377 = vector.shape_cast %374 : vector<16x3xf32> to vector<1x16x3xf32>
    tpu.vector_store %arg10[%c0_186, %c0_187, %c0_188], %377 {strides = array<i32>} : memref<1x16x3xf32, #tpu.memory_space<vmem>>, vector<1x16x3xf32>,
    return
  }
  func.func @transform_0(%arg0: i32) -> i32 {
    %c0_i32 = arith.constant 0 : i32
    %c0_i32_0 = arith.constant 0 : i32
    return %c0_i32 : i32
  }
  func.func @transform_1(%arg0: i32) -> (i32, i32) {
    %c0_i32 = arith.constant 0 : i32
    %c0_i32_0 = arith.constant 0 : i32
    %c0_i32_1 = arith.constant 0 : i32
    return %c0_i32, %c0_i32_0 : i32, i32
  }
  func.func @transform_2(%arg0: i32) -> (i32, i32, i32) {
    %c0_i32 = arith.constant 0 : i32
    %c0_i32_0 = arith.constant 0 : i32
    %c0_i32_1 = arith.constant 0 : i32
    return %arg0, %c0_i32, %c0_i32_0 : i32, i32, i32
  }
  func.func @transform_3(%arg0: i32) -> (i32, i32) {
    %c0_i32 = arith.constant 0 : i32
    %c0_i32_0 = arith.constant 0 : i32
    %c0_i32_1 = arith.constant 0 : i32
    return %c0_i32, %c0_i32_0 : i32, i32
  }
  func.func @transform_4(%arg0: i32) -> (i32, i32) {
    %c0_i32 = arith.constant 0 : i32
    %c0_i32_0 = arith.constant 0 : i32
    %c0_i32_1 = arith.constant 0 : i32
    return %c0_i32, %c0_i32_0 : i32, i32
  }
  func.func @transform_5(%arg0: i32) -> (i32, i32, i32) {
    %c0_i32 = arith.constant 0 : i32
    %c0_i32_0 = arith.constant 0 : i32
    %c0_i32_1 = arith.constant 0 : i32
    %c0_i32_2 = arith.constant 0 : i32
    return %c0_i32, %c0_i32_0, %c0_i32_1 : i32, i32, i32
  }
  func.func @transform_6(%arg0: i32) -> (i32, i32) {
    %c0_i32 = arith.constant 0 : i32
    %c0_i32_0 = arith.constant 0 : i32
    %c0_i32_1 = arith.constant 0 : i32
    return %c0_i32, %c0_i32_0 : i32, i32
  }
  func.func @transform_7(%arg0: i32) -> (i32, i32, i32) {
    %c0_i32 = arith.constant 0 : i32
    %c0_i32_0 = arith.constant 0 : i32
    %c0_i32_1 = arith.constant 0 : i32
    %c0_i32_2 = arith.constant 0 : i32
    return %c0_i32, %c0_i32_0, %c0_i32_1 : i32, i32, i32
  }
  func.func @transform_8(%arg0: i32) -> (i32, i32) {
    %c0_i32 = arith.constant 0 : i32
    %c0_i32_0 = arith.constant 0 : i32
    %c0_i32_1 = arith.constant 0 : i32
    return %c0_i32, %c0_i32_0 : i32, i32
  }
  func.func @transform_9(%arg0: i32) -> (i32, i32, i32) {
    %c0_i32 = arith.constant 0 : i32
    %c0_i32_0 = arith.constant 0 : i32
    %c0_i32_1 = arith.constant 0 : i32
    return %arg0, %c0_i32, %c0_i32_0 : i32, i32, i32
  }
}

</mosaic_0001>

<bundles_post_ra>
// kernel: generator_forward.1
= control target key start
LH: loop header
LB: loop body
LE: loop exit
PB: predicated region body
PF: predicated region fallthrough
CT: control target
= control target key end

     0   :  { %14 = vsyncpa [#allocation4], 0  ;;  %s2170_s30 = smov 0   ;;  %s2818_s0 = inlined_call_operand.vmem [shape: f32[4], index: 0, kind: input, shape index: {}]   ;;  %s2819_s1 = inlined_call_operand.vmem [shape: s32[16,1], index: 1, kind: input, shape index: {}]   ;;  %s2820_s2 = inlined_call_operand.vmem [shape: f32[2,16,512], index: 2, kind: input, shape index: {}]   ;;  %s2821_s3 = inlined_call_operand.vmem [shape: f32[512,16], index: 3, kind: input, shape index: {}]   ;;  %s2822_s4 = inlined_call_operand.vmem [shape: f32[1,16], index: 4, kind: input, shape index: {}]   ;;  %s2823_s5 = inlined_call_operand.vmem [shape: f32[9,16,16], index: 5, kind: input, shape index: {}]   ;;  %s2824_s6 = inlined_call_operand.vmem [shape: f32[1,16], index: 6, kind: input, shape index: {}]   ;;  %s2825_s7 = inlined_call_operand.vmem [shape: f32[9,16,3], index: 7, kind: input, shape index: {}]   ;;  %s2826_s8 = inlined_call_operand.vmem [shape: f32[1,3], index: 8, kind: input, shape index: {}]   ;;  %s2827_s9 = inlined_call_operand.vmem [shape: f32[2,16,3], index: 9, kind: output, shape index: {}]  }
   0x1 LB: > { %s2176_s10 = sadd.s32 4294967295, %s2114_s30   ;;  %p1801_p0 = scmp.ge.s32.totalorder %s2114_s30, 1  ;;  %s2114_s30 = sphi %s2170_s30, %s20_s30  }
   0x2   : > { %p245_p1 = scmp.lt.s32.totalorder %s2114_s30, 3  ;;  %s258_s13 = sshll.u32 %s2818_s0, 4  ;;  %s259_s13 = int_to_ptr.vmem [resolvable:$true] %s258_s13 }
   0x3   : > { %p2065_p3 = scmp.eq.s32.totalorder %s2176_s10, 0  ;;  %s2089_s15 = scalar_lea.vmem %s259_s13, 16 }
   0x4   : > { %p2183_p2 = pnand %p1801_p0, %p245_p1  ;;  %p2090_p6 = scmp.ne.s32.totalorder %s259_s13, %s2089_s15 }
   0x5   : > { %p2097_p10 = scmp.lt.s32.totalorder %s259_s13, %s259_s13  ;;  %p2098_p11 = scmp.lt.s32.totalorder %s2089_s15, %s2089_s15 }
   0x6   : > { %p2061_p4 = pneg %p2183_p2 }
   0x7   : > { %p2099_p12 = por %p2098_p11, %p2097_p10 }
   0x8   : > { %p2062_p5 = pnand %p2065_p3, %p2061_p4 }
   0xa   : > { %p2091_p7 = pneg %p2062_p5 }
   0xc   : > { %p2092_p8 = pnand %p2091_p7, %p2090_p6 }
   0xe   : > { %p2093_p9 = pneg %p2092_p8 }
  0x10   : > { %p2100_p13 = pnand %p2099_p12, %p2093_p9 }
  0x12   : > { %2103 = shalt.err (!%p2100_p13)
}
  0x13   : > { %s2116_s16 = smov [#allocation3]   ;;  %300 = sbr.rel (%p2183_p2) target bundleno = 1149 (0x47d), region = 56 }
  0x14   : > { %2064 = dma.vmem_to_smem (!%p2062_p5), %s259_s13, 16, %s2116_s16, [#allocation4]  }
  0x1a   : > { %2109 = dma.done.wait (%p2065_p3), [#allocation4], 16  }
  0x1b   : > { %2111 = vsyncadd (%p2065_p3), [#allocation4], 4294967280 }
  0x1c   : > { %306 = sfence }
  0x1d   : > { %s350_s17 = sld [smem:[#allocation3]]  ;;  %v367_v0 = vld [vmem:[%s2821_s3 + $0x80] sm:$0xff]  ;;  %v368_v1 = vld [vmem:[%s2821_s3 + $0x88] sm:$0xff]  ;;  %v369_v9 = vld [vmem:[%s2821_s3 + $0x90] sm:$0xff]  ;;  %p337_p0 = scmp.lt.s32.totalorder %s2176_s10, 1  ;;  %vm615_vm9 = vcmask 130048  }
  0x1e   : > { %v399_v2 = vld [vmem:[%s2821_s3 + $0x180] sm:$0xff]  ;;  %v400_v3 = vld [vmem:[%s2821_s3 + $0x188] sm:$0xff]  ;;  %v370_v10 = vld [vmem:[%s2821_s3 + $0x98] sm:$0xff]  ;;  %s1811_s23 = sld [smem:[#allocation3 + $0x1]]  ;;  %vm2119_vm13 = vmmov 0   ;;  %s1838_s24 = sld [smem:[#allocation3 + $0x2]] }
  0x1f   : > { %v351_v4 = vld [vmem:[%s2821_s3] sm:$0xff]  ;;  %v352_v5 = vld [vmem:[%s2821_s3 + $0x8] sm:$0xff]  ;;  %v401_v15 = vld [vmem:[%s2821_s3 + $0x190] sm:$0xff]  ;;  %s2830_s10 = smov (!%p337_p0, %s2176_s10), 1 }
  0x20   : > { %v383_v6 = vld [vmem:[%s2821_s3 + $0x100] sm:$0xff]  ;;  %v384_v7 = vld [vmem:[%s2821_s3 + $0x108] sm:$0xff]  ;;  %v402_v16 = vld [vmem:[%s2821_s3 + $0x198] sm:$0xff]  ;;  %s1867_s25 = sshll.u32 %s2830_s10, 6 }
  0x21   : > { %v353_v21 = vld [vmem:[%s2821_s3 + $0x10] sm:$0xff]  ;;  %v354_v22 = vld [vmem:[%s2821_s3 + $0x18] sm:$0xff]  ;;  %v371_v33 = vld [vmem:[%s2821_s3 + $0xa0] sm:$0xff] }
  0x22   : > { %v385_v27 = vld [vmem:[%s2821_s3 + $0x110] sm:$0xff]  ;;  %v386_v28 = vld [vmem:[%s2821_s3 + $0x118] sm:$0xff]  ;;  %v372_v34 = vld [vmem:[%s2821_s3 + $0xa8] sm:$0xff] }
  0x23   : > { %v2222_v8 = vstv %s350_s17  ;;  %v403_v35 = vld [vmem:[%s2821_s3 + $0x1a0] sm:$0xff]  ;;  %v404_v39 = vld [vmem:[%s2821_s3 + $0x1a8] sm:$0xff]  ;;  %v373_v47 = vld [vmem:[%s2821_s3 + $0xb0] sm:$0xff]  ;;  %s2431_s17 = scalar_lea.vmem %s2820_s2, %s1867_s25 }
  0x24   : > { %v432_v11 = vmul.f32 %v2222_v8, %v367_v0  ;;  %v433_v12 = vmul.f32 %v2222_v8, %v368_v1  ;;  %v464_v13 = vmul.f32 %v2222_v8, %v399_v2  ;;  %v465_v14 = vmul.f32 %v2222_v8, %v400_v3  ;;  %v355_v40 = vld [vmem:[%s2821_s3 + $0x20] sm:$0xff]  ;;  %v356_v41 = vld [vmem:[%s2821_s3 + $0x28] sm:$0xff]  ;;  %v374_v52 = vld [vmem:[%s2821_s3 + $0xb8] sm:$0xff] }
  0x25   : > { %v416_v17 = vmul.f32 %v2222_v8, %v351_v4  ;;  %v417_v18 = vmul.f32 %v2222_v8, %v352_v5  ;;  %v448_v19 = vmul.f32 %v2222_v8, %v383_v6  ;;  %v449_v20 = vmul.f32 %v2222_v8, %v384_v7  ;;  %v387_v45 = vld [vmem:[%s2821_s3 + $0x120] sm:$0xff]  ;;  %v388_v46 = vld [vmem:[%s2821_s3 + $0x128] sm:$0xff]  ;;  %v405_v57 = vld [vmem:[%s2821_s3 + $0x1b0] sm:$0xff] }
  0x26   : > { %v488_v23 = vpack.c.bf16 %v433_v12, %v432_v11  ;;  %v504_v24 = vpack.c.bf16 %v465_v14, %v464_v13  ;;  %v434_v25 = vmul.f32 %v2222_v8, %v369_v9  ;;  %v435_v26 = vmul.f32 %v2222_v8, %v370_v10  ;;  %v406_v58 = vld [vmem:[%s2821_s3 + $0x1b8] sm:$0xff]  ;;  %v357_v59 = vld [vmem:[%s2821_s3 + $0x30] sm:$0xff]  ;;  %v375_v6 = vld [vmem:[%s2821_s3 + $0xc0] sm:$0xff] }
  0x27   : > { %v480_v29 = vpack.c.bf16 %v417_v18, %v416_v17  ;;  %v496_v30 = vpack.c.bf16 %v449_v20, %v448_v19  ;;  %v466_v31 = vmul.f32 %v2222_v8, %v401_v15  ;;  %v467_v32 = vmul.f32 %v2222_v8, %v402_v16  ;;  %v358_v0 = vld [vmem:[%s2821_s3 + $0x38] sm:$0xff]  ;;  %v389_v1 = vld [vmem:[%s2821_s3 + $0x130] sm:$0xff]  ;;  %v376_v7 = vld [vmem:[%s2821_s3 + $0xc8] sm:$0xff] }
  0x28   : > { %1869 = vmatprep.subr.bf16.mxu0 %v488_v23  ;;  %1891 = vmatprep.subr.bf16.mxu1 %v504_v24  ;;  %v489_v36 = vpack.c.bf16 %v435_v26, %v434_v25  ;;  %v418_v37 = vmul.f32 %v2222_v8, %v353_v21  ;;  %v419_v38 = vmul.f32 %v2222_v8, %v354_v22  ;;  %v390_v2 = vld [vmem:[%s2821_s3 + $0x138] sm:$0xff]  ;;  %v407_v9 = vld [vmem:[%s2821_s3 + $0x1c0] sm:$0xff]  ;;  %v408_v14 = vld [vmem:[%s2821_s3 + $0x1c8] sm:$0xff] }
  0x29   : > { %1870 = vmatpush3.bf16.msra.mxu0 %v480_v29  ;;  %1892 = vmatpush3.bf16.msra.mxu1 %v496_v30  ;;  %v505_v42 = vpack.c.bf16 %v467_v32, %v466_v31  ;;  %v450_v43 = vmul.f32 %v2222_v8, %v385_v27  ;;  %v451_v44 = vmul.f32 %v2222_v8, %v386_v28  ;;  %v359_v19 = vld [vmem:[%s2821_s3 + $0x40] sm:$0xff]  ;;  %v360_v20 = vld [vmem:[%s2821_s3 + $0x48] sm:$0xff]  ;;  %v377_v27 = vld [vmem:[%s2821_s3 + $0xd0] sm:$0xff] }
  0x2a   : > { %1871 = vmatprep.subr.bf16.mxu0 %v489_v36  ;;  %v481_v48 = vpack.c.bf16 %v419_v38, %v418_v37  ;;  %v436_v49 = vmul.f32 %v2222_v8, %v371_v33  ;;  %v437_v50 = vmul.f32 %v2222_v8, %v372_v34  ;;  %v468_v51 = vmul.f32 %v2222_v8, %v403_v35  ;;  %v391_v25 = vld [vmem:[%s2821_s3 + $0x140] sm:$0xff]  ;;  %v392_v26 = vld [vmem:[%s2821_s3 + $0x148] sm:$0xff]  ;;  %v378_v31 = vld [vmem:[%s2821_s3 + $0xd8] sm:$0xff] }
  0x2b   : > { %1893 = vmatprep.subr.bf16.mxu1 %v505_v42  ;;  %v497_v53 = vpack.c.bf16 %v451_v44, %v450_v43  ;;  %v469_v54 = vmul.f32 %v2222_v8, %v404_v39  ;;  %v420_v55 = vmul.f32 %v2222_v8, %v355_v40  ;;  %v421_v56 = vmul.f32 %v2222_v8, %v356_v41  ;;  %v409_v32 = vld [vmem:[%s2821_s3 + $0x1d0] sm:$0xff]  ;;  %v410_v33 = vld [vmem:[%s2821_s3 + $0x1d8] sm:$0xff] }
  0x2c   : > { %v490_v60 = vpack.c.bf16 %v437_v50, %v436_v49  ;;  %v452_v61 = vmul.f32 %v2222_v8, %v387_v45  ;;  %v453_v62 = vmul.f32 %v2222_v8, %v388_v46  ;;  %v438_v63 = vmul.f32 %v2222_v8, %v373_v47  ;;  %v361_v37 = vld [vmem:[%s2821_s3 + $0x50] sm:$0xff]  ;;  %v362_v38 = vld [vmem:[%s2821_s3 + $0x58] sm:$0xff]  ;;  %v379_v49 = vld [vmem:[%s2821_s3 + $0xe0] sm:$0xff] }
  0x2d   : > { %1872 = vmatpush3.bf16.msra.mxu0 %v481_v48  ;;  %1894 = vmatpush3.bf16.msra.mxu1 %v497_v53  ;;  %v506_v3 = vpack.c.bf16 %v469_v54, %v468_v51  ;;  %v482_v4 = vpack.c.bf16 %v421_v56, %v420_v55  ;;  %v439_v5 = vmul.f32 %v2222_v8, %v374_v52  ;;  %v393_v43 = vld [vmem:[%s2821_s3 + $0x150] sm:$0xff]  ;;  %v394_v44 = vld [vmem:[%s2821_s3 + $0x158] sm:$0xff]  ;;  %v380_v50 = vld [vmem:[%s2821_s3 + $0xe8] sm:$0xff] }
  0x2e   : > { %1873 = vmatprep.subr.bf16.mxu0 %v490_v60  ;;  %v498_v10 = vpack.c.bf16 %v453_v62, %v452_v61  ;;  %v470_v11 = vmul.f32 %v2222_v8, %v405_v57  ;;  %v471_v12 = vmul.f32 %v2222_v8, %v406_v58  ;;  %v422_v13 = vmul.f32 %v2222_v8, %v357_v59  ;;  %v411_v51 = vld [vmem:[%s2821_s3 + $0x1e0] sm:$0xff]  ;;  %v412_v55 = vld [vmem:[%s2821_s3 + $0x1e8] sm:$0xff] }
  0x2f   : > { %1895 = vmatprep.subr.bf16.mxu1 %v506_v3  ;;  %v491_v15 = vpack.c.bf16 %v439_v5, %v438_v63  ;;  %v423_v16 = vmul.f32 %v2222_v8, %v358_v0  ;;  %v454_v17 = vmul.f32 %v2222_v8, %v389_v1  ;;  %v455_v18 = vmul.f32 %v2222_v8, %v390_v2  ;;  %v363_v56 = vld [vmem:[%s2821_s3 + $0x60] sm:$0xff]  ;;  %v364_v57 = vld [vmem:[%s2821_s3 + $0x68] sm:$0xff]  ;;  %v381_v2 = vld [vmem:[%s2821_s3 + $0xf0] sm:$0xff] }
  0x30   : > { %v507_v21 = vpack.c.bf16 %v471_v12, %v470_v11  ;;  %v440_v22 = vmul.f32 %v2222_v8, %v375_v6  ;;  %v441_v23 = vmul.f32 %v2222_v8, %v376_v7  ;;  %v472_v24 = vmul.f32 %v2222_v8, %v407_v9  ;;  %v395_v61 = vld [vmem:[%s2821_s3 + $0x160] sm:$0xff]  ;;  %v396_v1 = vld [vmem:[%s2821_s3 + $0x168] sm:$0xff]  ;;  %v382_v7 = vld [vmem:[%s2821_s3 + $0xf8] sm:$0xff] }
  0x31   : > { %1874 = vmatpush3.bf16.msra.mxu0 %v482_v4  ;;  %1896 = vmatpush3.bf16.msra.mxu1 %v498_v10  ;;  %v483_v28 = vpack.c.bf16 %v423_v16, %v422_v13  ;;  %v499_v29 = vpack.c.bf16 %v455_v18, %v454_v17  ;;  %v473_v30 = vmul.f32 %v2222_v8, %v408_v14  ;;  %v413_v9 = vld [vmem:[%s2821_s3 + $0x1f0] sm:$0xff]  ;;  %v414_v10 = vld [vmem:[%s2821_s3 + $0x1f8] sm:$0xff] }
  0x32   : > { %1875 = vmatprep.subr.bf16.mxu0 %v491_v15  ;;  %1897 = vmatprep.subr.bf16.mxu1 %v507_v21  ;;  %v492_v34 = vpack.c.bf16 %v441_v23, %v440_v22  ;;  %v424_v35 = vmul.f32 %v2222_v8, %v359_v19  ;;  %v425_v36 = vmul.f32 %v2222_v8, %v360_v20  ;;  %v365_v14 = vld [vmem:[%s2821_s3 + $0x70] sm:$0xff]  ;;  %v366_v15 = vld [vmem:[%s2821_s3 + $0x78] sm:$0xff]  ;;  %v513_v21 = vld [vmem:[%s2431_s17 + $0x8] sm:$0xff] }
  0x33   : > { %v508_v39 = vpack.c.bf16 %v473_v30, %v472_v24  ;;  %v456_v40 = vmul.f32 %v2222_v8, %v391_v25  ;;  %v457_v41 = vmul.f32 %v2222_v8, %v392_v26  ;;  %v442_v42 = vmul.f32 %v2222_v8, %v377_v27  ;;  %v397_v19 = vld [vmem:[%s2821_s3 + $0x170] sm:$0xff]  ;;  %v398_v20 = vld [vmem:[%s2821_s3 + $0x178] sm:$0xff]  ;;  %v517_v26 = vld [vmem:[%s2431_s17 + $0x28] sm:$0xff] }
  0x34   : > { %v484_v45 = vpack.c.bf16 %v425_v36, %v424_v35  ;;  %v443_v46 = vmul.f32 %v2222_v8, %v378_v31  ;;  %v474_v47 = vmul.f32 %v2222_v8, %v409_v32  ;;  %v475_v48 = vmul.f32 %v2222_v8, %v410_v33  ;;  %v515_v27 = vld [vmem:[%s2431_s17 + $0x18] sm:$0xff] }
  0x35   : > { %1876 = vmatpush3.bf16.msra.mxu0 %v483_v28  ;;  %1898 = vmatpush3.bf16.msra.mxu1 %v499_v29  ;;  %v500_v52 = vpack.c.bf16 %v457_v41, %v456_v40  ;;  %v426_v53 = vmul.f32 %v2222_v8, %v361_v37  ;;  %v427_v54 = vmul.f32 %v2222_v8, %v362_v38  ;;  %v519_v28 = vld [vmem:[%s2431_s17 + $0x38] sm:$0xff] }
  0x36   : > { %1877 = vmatprep.subr.bf16.mxu0 %v492_v34  ;;  %1899 = vmatprep.subr.bf16.mxu1 %v508_v39  ;;  %v493_v58 = vpack.c.bf16 %v443_v46, %v442_v42  ;;  %v509_v59 = vpack.c.bf16 %v475_v48, %v474_v47  ;;  %v458_v60 = vmul.f32 %v2222_v8, %v393_v43  ;;  %v512_v39 = vld [vmem:[%s2431_s17] sm:$0xff]  ;;  %v514_v43 = vld [vmem:[%s2431_s17 + $0x10] sm:$0xff]  ;;  %v349_v47 = vld [vmem:[%s2819_s1 + $0x8] sm:$0xff]  ;;  %v2117_v48 = vmov 0  }
  0x37   : > { %v459_v62 = vmul.f32 %v2222_v8, %v394_v44  ;;  %v444_v63 = vmul.f32 %v2222_v8, %v379_v49  ;;  %v445_v0 = vmul.f32 %v2222_v8, %v380_v50  ;;  %v476_v3 = vmul.f32 %v2222_v8, %v411_v51  ;;  %v516_v42 = vld [vmem:[%s2431_s17 + $0x20] sm:$0xff]  ;;  %v518_v44 = vld [vmem:[%s2431_s17 + $0x30] sm:$0xff]  ;;  %2079 = vset.pattern.permute.xlu1 %v2117_v48 }
  0x38   : > { %v477_v4 = vmul.f32 %v2222_v8, %v412_v55  ;;  %v428_v5 = vmul.f32 %v2222_v8, %v363_v56  ;;  %v429_v6 = vmul.f32 %v2222_v8, %v364_v57  ;;  %v485_v11 = vpack.c.bf16 %v427_v54, %v426_v53  ;;  %2080 = vset.pattern.permute.xlu0 %v2117_v48 }
  0x39   : > { %1878 = vmatpush3.bf16.msra.mxu0 %v484_v45  ;;  %1900 = vmatpush3.bf16.msra.mxu1 %v500_v52  ;;  %v501_v12 = vpack.c.bf16 %v459_v62, %v458_v60  ;;  %v460_v13 = vmul.f32 %v2222_v8, %v395_v61  ;;  %v494_v16 = vpack.c.bf16 %v445_v0, %v444_v63  ;;  %v647_v50 = vadd.s32 4294967295, %v349_v47  ;;  %v1810_v60 = vld [vmem:[%s2822_s4] ss:$0 sm:$0xff] }
  0x3a   : > { %1879 = vmatprep.subr.bf16.mxu0 %v493_v58  ;;  %1901 = vmatprep.subr.bf16.mxu1 %v509_v59  ;;  %v510_v17 = vpack.c.bf16 %v477_v4, %v476_v3  ;;  %v461_v18 = vmul.f32 %v2222_v8, %v396_v1  ;;  %v446_v22 = vmul.f32 %v2222_v8, %v381_v2  ;;  %v773_v55 = vadd.s32 1, %v349_v47 }
  0x3b   : > { %v447_v23 = vmul.f32 %v2222_v8, %v382_v7  ;;  %v478_v24 = vmul.f32 %v2222_v8, %v413_v9  ;;  %v479_v25 = vmul.f32 %v2222_v8, %v414_v10  ;;  %v486_v29 = vpack.c.bf16 %v429_v6, %v428_v5 }
  0x3c   : > { %v502_v30 = vpack.c.bf16 %v461_v18, %v460_v13  ;;  %v430_v31 = vmul.f32 %v2222_v8, %v365_v14  ;;  %v431_v32 = vmul.f32 %v2222_v8, %v366_v15  ;;  %v462_v34 = vmul.f32 %v2222_v8, %v397_v19  ;;  %v1813_v18 = vld [vmem:[%s2823_s5 + $0x18] sm:$0xff] }
  0x3d   : > { %1880 = vmatpush3.bf16.msra.mxu0 %v485_v11  ;;  %1902 = vmatpush3.bf16.msra.mxu1 %v501_v12  ;;  %v495_v33 = vpack.c.bf16 %v447_v23, %v446_v22  ;;  %v463_v35 = vmul.f32 %v2222_v8, %v398_v20  ;;  %v511_v36 = vpack.c.bf16 %v479_v25, %v478_v24  ;;  %v348_v8 = vld [vmem:[%s2819_s1] sm:$0xff]  ;;  %vm649_vm2 = vcmp.ge.s32.totalorder %v647_v50, 0  ;;  %v667_v23 = vld [vmem:[%s2823_s5 + $0x8] sm:$0xff] }
  0x3e   : > { %1881 = vmatprep.subr.bf16.mxu0 %v494_v16  ;;  %1903 = vmatprep.subr.bf16.mxu1 %v510_v17  ;;  %v521_v37 = vpack.c.bf16 %v517_v26, %v513_v21  ;;  %v523_v38 = vpack.c.bf16 %v519_v28, %v515_v27  ;;  %v487_v40 = vpack.c.bf16 %v431_v32, %v430_v31  ;;  %v646_v49 = vadd.s32 4294967295, %v348_v8  ;;  %v1812_v17 = vld [vmem:[%s2823_s5 + $0x10] sm:$0xff]  ;;  %v666_v22 = vld [vmem:[%s2823_s5] sm:$0xff] }
  0x3f   : > { %v503_v41 = vpack.c.bf16 %v463_v35, %v462_v34  ;;  %v520_v45 = vpack.c.bf16 %v516_v42, %v512_v39  ;;  %v522_v46 = vpack.c.bf16 %v518_v44, %v514_v43  ;;  %v772_v51 = vadd.s32 1, %v348_v8  ;;  %v1819_v42 = vld [vmem:[%s2823_s5 + $0x30] sm:$0xff]  ;;  %v1820_v43 = vld [vmem:[%s2823_s5 + $0x38] sm:$0xff]  ;;  %v1816_v44 = vld [vmem:[%s2823_s5 + $0x20] sm:$0xff] }
  0x40   : > { %563 = vmatprep.mubr.bf16.mxu0 %v521_v37  ;;  %604 = vmatprep.mubr.bf16.mxu1 %v523_v38  ;;  %vm648_vm0 = vcmp.ge.s32.totalorder %v646_v49, 0  ;;  %vm650_vm1 = vcmp.lt.s32.totalorder %v646_v49, 4  ;;  %vm651_vm3 = vcmp.lt.s32.totalorder %v647_v50, 4  ;;  %v2118_v56 = vmov 0.0  }
  0x41   : > { %1882 = vmatpush3.bf16.msra.mxu0 %v486_v29  ;;  %1904 = vmatpush3.bf16.msra.mxu1 %v502_v30  ;;  %vm652_vm4 = vmand %vm648_vm0, %vm650_vm1  ;;  %vm774_vm5 = vcmp.ge.s32.totalorder %v772_v51, 0  ;;  %vm776_vm6 = vcmp.lt.s32.totalorder %v772_v51, 4  ;;  %638 = vst.msk [vmem:[#allocation2 + $0x8] sm:$0xff] %vm615_vm9, %v2118_v56  ;;  %vm775_vm10 = vcmp.ge.s32.totalorder %v773_v55, 0  ;;  %vm777_vm11 = vcmp.lt.s32.totalorder %v773_v55, 4 }
  0x42   : > { %1883 = vmatprep.subr.bf16.mxu0 %v495_v33  ;;  %1905 = vmatprep.subr.bf16.mxu1 %v511_v36  ;;  %v654_v52 = vsel %vm652_vm4, 1, %v2117_v48  ;;  %vm653_vm7 = vmand %vm649_vm2, %vm651_vm3  ;;  %637 = vst.msk [vmem:[#allocation2] sm:$0xff] %vm615_vm9, %v2118_v56  ;;  %v2497_v16 = vstv %s1811_s23  ;;  %s1868_s23 = sshll.u32 %s2830_s10, 4 }
  0x43   : > { %657 = vperm.xlu1 %2079, %v654_v52   ;;  %vm778_vm8 = vmand %vm774_vm5, %vm776_vm6  ;;  %v655_v53 = vsel %vm653_vm7, 1, %v2117_v48  ;;  %639 = vst.msk [vmem:[#allocation2 + $0x10] sm:$0xff] %vm615_vm9, %v2118_v56  ;;  %v678_v19 = vmul.f32 %v1812_v17, %v2497_v16  ;;  %v679_v20 = vmul.f32 %v1813_v18, %v2497_v16  ;;  %v669_v24 = vmul.f32 %v2497_v16, %v666_v22  ;;  %v1831_v18 = vld [vmem:[%s2823_s5 + $0x70] sm:$0xff]  ;;  %v1828_v22 = vld [vmem:[%s2823_s5 + $0x60] sm:$0xff]  ;;  %s346_s25 = scalar_lea.vmem %s2827_s9, %s1868_s23 }
  0x44   : > { %v780_v54 = vsel %vm778_vm8, 1, %v2117_v48  ;;  %640 = vst.msk [vmem:[#allocation2 + $0x18] sm:$0xff] %vm615_vm9, %v2118_v56  ;;  %vm779_vm12 = vmand %vm775_vm10, %vm777_vm11  ;;  %v670_v25 = vmul.f32 %v2497_v16, %v667_v23  ;;  %v852_v8 = vmul.f32 %v1819_v42, %v2497_v16  ;;  %v853_v47 = vmul.f32 %v1820_v43, %v2497_v16 }
  0x45   : > { %1884 = vmatpush3.bf16.msra.mxu0 %v487_v40  ;;  %1906 = vmatpush3.bf16.msra.mxu1 %v503_v41  ;;  %v781_v57 = vsel %vm779_vm12, 1, %v2117_v48  ;;  %v680_v21 = vpack.c.bf16 %v679_v20, %v678_v19  ;;  %v795_v49 = vmul.f32 %v1816_v44, %v2497_v16  ;;  %v1832_v19 = vld [vmem:[%s2823_s5 + $0x78] sm:$0xff]  ;;  %vm1729_vm6 = vcmask 23552  }
  0x46   : > { %1949 = vmatprep.subr.bf16.mxu0 %v2118_v56  ;;  %1955 = vmatprep.subr.bf16.mxu1 %v2118_v56  ;;  %v671_v26 = vpack.c.bf16 %v670_v25, %v669_v24 }
  0x47   : > { %660 = vperm.xlu1 %2079, %v655_v53  }
  0x48   : > { %564 = vmatmul.mubr.bf16.vlgmr.msra.gmra.mrb[0].mxu0 %v520_v45  ;;  %605 = vmatmul.mubr.bf16.vlgmr.msra.gmra.mrb[0].mxu1 %v522_v46  ;;  %v1817_v45 = vld [vmem:[%s2823_s5 + $0x28] sm:$0xff] }
  0x49   : > { %1950 = vmatpush3.bf16.msra.mxu0 %v680_v21  ;;  %1956 = vmatpush3.bf16.msra.mxu1 %v671_v26  ;;  %v796_v50 = vmul.f32 %v1817_v45, %v2497_v16  ;;  %v1829_v26 = vld [vmem:[%s2823_s5 + $0x68] sm:$0xff] }
  0x4a   : > { %1961 = vmatprep.subr.bf16.mxu0 %v2118_v56  ;;  %1951 = vmatprep.mubr.msk.bf16.mxu0 %vm2119_vm13, %v2118_v56 }
  0x4b   : > { %786 = vperm.xlu1 %2079, %v781_v57   ;;  %1957 = vmatprep.mubr.msk.bf16.mxu1 %vm2119_vm13, %v2118_v56 }
  0x4c   : > { %1967 = vmatprep.subr.bf16.mxu1 %v2118_v56 }
  0xc2   : > { %v2522_v40 = vpop.permute.xlu1 %657 }
  0xc3   : > { %vm662_vm0 = vcmp.eq.s32.totalorder %v2522_v40, 1 }
  0xc6   : > { %v2537_v46 = vpop.permute.xlu1 %660 }
  0xc7   : > { %vm663_vm1 = vcmp.eq.s32.totalorder %v2537_v46, 1 }
 0x11b   : > { %v1885_v58 = vpop.f32.mrb[0].mxu0  ;;  %v1907_v59 = vpop.f32.mrb[0].mxu1 }
 0x11c   : > { %v1886_v61 = vpop.f32.mrb[1].mxu0  ;;  %v1908_v62 = vpop.f32.mrb[1].mxu1 }
 0x11d   : > { %v1887_v63 = vadd.f32 %v1886_v61, %v1885_v58  ;;  %v1909_v0 = vadd.f32 %v1908_v62, %v1907_v59  ;;  %v1888_v1 = vpop.f32.mrb[2].mxu0  ;;  %v1910_v2 = vpop.f32.mrb[2].mxu1  ;;  %v1825_v58 = vld [vmem:[%s2823_s5 + $0x50] sm:$0xff]  ;;  %v1826_v59 = vld [vmem:[%s2823_s5 + $0x58] sm:$0xff]  ;;  %v797_v62 = vpack.c.bf16 %v796_v50, %v795_v49 }
 0x11e   : > { %v1889_v3 = vpop.f32.mrb[3].mxu0  ;;  %v1911_v4 = vpop.f32.mrb[3].mxu1 }
 0x11f   : > { %v566_v5 = vadd.f32 %v1887_v63, %v1810_v60  ;;  %v1890_v6 = vadd.f32 %v1889_v3, %v1888_v1  ;;  %v1912_v7 = vadd.f32 %v1911_v4, %v1910_v2  ;;  %v1822_v1 = vld [vmem:[%s2823_s5 + $0x40] sm:$0xff]  ;;  %v1823_v2 = vld [vmem:[%s2823_s5 + $0x48] sm:$0xff]  ;;  %v964_v4 = vmul.f32 %v1825_v58, %v2497_v16 }
 0x121   : > { %v607_v9 = vadd.f32 %v1909_v0, %v566_v5  ;;  %v569_v10 = vadd.f32 %v1890_v6, %v1810_v60  ;;  %v2560_v60 = vpop.permute.xlu1 %786  ;;  %v965_v5 = vmul.f32 %v1826_v59, %v2497_v16 }
 0x122   : > { %vm789_vm2 = vcmp.eq.s32.totalorder %v2560_v60, 1 }
 0x123   : > { %v610_v11 = vadd.f32 %v1912_v7, %v569_v10  ;;  %v613_v12 = vmul.f32 %v607_v9, %v607_v9  ;;  %v907_v10 = vmul.f32 %v1822_v1, %v2497_v16 }
 0x125   : > { %v616_v13 = vsel %vm615_vm9, %v613_v12, 0.0  ;;  %v614_v14 = vmul.f32 %v610_v11, %v610_v11 }
 0x126   : > { %617 = vadd.xlane.f32.xlu0 %v616_v13 }
 0x127   : > { %v619_v15 = vsel %vm615_vm9, %v614_v14, 0.0 }
 0x12a   : > { %620 = vadd.xlane.f32.xlu0 %v619_v15  ;;  %v966_v15 = vpack.c.bf16 %v965_v5, %v964_v4 }
 0x140   : > { %783 = vperm.xlu0 %2080, %v780_v54   ;;  %v854_v54 = vpack.c.bf16 %v853_v47, %v852_v8 }
 0x1b3   : > { %v618_v27 = vpop.xlane.xlu0 %617 }
 0x1b4   : > { %v623_v28 = vmul.f32 0.0625, %v618_v27  ;;  %v1076_v27 = vmul.f32 %v1831_v18, %v2497_v16 }
 0x1b6   : > { %v625_v29 = vadd.f32 1e-08, %v623_v28  ;;  %v1077_v28 = vmul.f32 %v1832_v19, %v2497_v16 }
 0x1b7   : > { %v621_v30 = vpop.xlane.xlu0 %620 }
 0x1b8   : > { %2081 = vrsqrt.f32 %v625_v29  ;;  %v624_v31 = vmul.f32 0.0625, %v621_v30 }
 0x1ba   : > { %v626_v32 = vadd.f32 1e-08, %v624_v31  ;;  %v1021_v31 = vmul.f32 %v1828_v22, %v2497_v16 }
 0x1bc   : > { %2083 = vrsqrt.f32 %v626_v32  ;;  %v1022_v32 = vmul.f32 %v1829_v26, %v2497_v16 }
 0x1bf   : > { %v2570_v3 = vpop.permute.xlu0 %783 }
 0x1c0   : > { %vm788_vm3 = vcmp.eq.s32.totalorder %v2570_v3, 1 }
 0x1c2   : > { %v2082_v33 = vpop.eup %2081 }
 0x1c3   : > { %v629_v34 = vmul.f32 %v2082_v33, %v607_v9 }
 0x1c5   : > { %vm631_vm14 = vcmp.ge.f32.partialorder %v629_v34, 0.0  ;;  %v633_v35 = vmul.f32 0.2, %v629_v34 }
 0x1c6   : > { %v2084_v36 = vpop.eup %2083 }
 0x1c7   : > { %v635_v37 = vsel %vm631_vm14, %v629_v34, %v633_v35  ;;  %v630_v38 = vmul.f32 %v2084_v36, %v610_v11  ;;  %v908_v11 = vmul.f32 %v1823_v2, %v2497_v16  ;;  %v1078_v34 = vpack.c.bf16 %v1077_v28, %v1076_v27 }
 0x1c8   : > { %641 = vst.msk [vmem:[#allocation2 + $0x8] sm:$0xff] %vm615_vm9, %v635_v37  ;;  %v1023_v37 = vpack.c.bf16 %v1022_v32, %v1021_v31 }
 0x1c9   : > { %vm632_vm15 = vcmp.ge.f32.partialorder %v630_v38, 0.0  ;;  %v634_v39 = vmul.f32 0.2, %v630_v38  ;;  %v909_v21 = vpack.c.bf16 %v908_v11, %v907_v10 }
 0x1cb   : > { %v636_v41 = vsel %vm632_vm15, %v630_v38, %v634_v39  ;;  %v1834_v39 = vld [vmem:[%s2823_s5 + $0x80] sm:$0xff] }
 0x1cc   : > { %642 = vst.msk [vmem:[#allocation2 + $0x10] sm:$0xff] %vm615_vm9, %v636_v41  ;;  %v1835_v41 = vld [vmem:[%s2823_s5 + $0x88] sm:$0xff]  ;;  %v1133_v43 = vmul.f32 %v1834_v39, %v2497_v16 }
 0x1cd   : > { %v1134_v44 = vmul.f32 %v1835_v41, %v2497_v16 }
 0x1cf   : > { %v644_v48 = vld [vmem:[#allocation2 + $0x3] sm:$0xff]  ;;  %v1135_v49 = vpack.c.bf16 %v1134_v44, %v1133_v43  ;;  %v1837_v43 = vld [vmem:[%s2824_s6] ss:$0 sm:$0xff] }
 0x1d0   : > { %v664_v52 = vsel %vm662_vm0, %v644_v48, 0.0  ;;  %v673_v61 = vld [vmem:[#allocation2 + $0x4] sm:$0xff] }
 0x1d1   : > { %v845_v6 = vld [vmem:[#allocation2 + $0x7] sm:$0xff] }
 0x1d2   : > { %v770_v12 = vld [vmem:[#allocation2 + $0x5] sm:$0xff]  ;;  %v847_v13 = vsel %vm662_vm0, %v845_v6, 0.0 }
 0x1d3   : > { %v2545_v51 = vld [vmem:[#allocation2 + $0xb] sm:$0xff]  ;;  %v790_v20 = vsel %vm788_vm3, %v770_v12, 0.0  ;;  %v1015_v42 = vld [vmem:[#allocation2 + $0x13] sm:$0xff] }
 0x1d4   : > { %v665_v53 = vsel %vm663_vm1, %v2545_v51, 0.0  ;;  %v2552_v57 = vld [vmem:[#allocation2 + $0xc] sm:$0xff]  ;;  %v1072_v45 = vld [vmem:[#allocation2 + $0x14] sm:$0xff]  ;;  %v1016_v8 = vsel %vm662_vm0, %v2545_v51, 0.0  ;;  %v1017_v47 = vsel %vm663_vm1, %v1015_v42, 0.0 }
 0x1d5   : > { %v672_v55 = vpack.c.bf16 %v665_v53, %v664_v52  ;;  %v846_v63 = vld [vmem:[#allocation2 + $0xf] sm:$0xff]  ;;  %v681_v0 = vpack.c.bf16 %v2552_v57, %v673_v61  ;;  %v1079_v48 = vpack.c.bf16 %v1072_v45, %v2552_v57  ;;  %v1024_v50 = vpack.c.bf16 %v1017_v47, %v1016_v8 }
 0x1d6   : > { %v2576_v7 = vld [vmem:[#allocation2 + $0xd] sm:$0xff]  ;;  %v848_v9 = vsel %vm663_vm1, %v846_v63, 0.0  ;;  %v1127_v16 = vld [vmem:[#allocation2 + $0x15] sm:$0xff] }
 0x1d7   : > { %1958 = vmatmul.mubr.msk.bf16.vlgmr.msra.gmra.mrb[4].mxu1 %vm615_vm9, %v672_v55  ;;  %1952 = vmatmul.mubr.msk.bf16.vlgmr.msra.gmra.mrb[4].mxu0 %vm615_vm9, %v681_v0  ;;  %v791_v14 = vsel %vm789_vm2, %v2576_v7, 0.0  ;;  %v855_v17 = vpack.c.bf16 %v848_v9, %v847_v13  ;;  %v957_v23 = vld [vmem:[#allocation2 + $0x9] sm:$0xff]  ;;  %v958_v25 = vld [vmem:[#allocation2 + $0x11] sm:$0xff]  ;;  %v1128_v51 = vsel %vm788_vm3, %v2576_v7, 0.0  ;;  %v1129_v52 = vsel %vm789_vm2, %v1127_v16, 0.0 }
 0x1d8   : > { %1968 = vmatpush3.bf16.msra.mxu1 %v854_v54  ;;  %1969 = vmatprep.mubr.msk.bf16.mxu1 %vm2119_vm13, %v2118_v56  ;;  %v798_v24 = vpack.c.bf16 %v791_v14, %v790_v20  ;;  %v959_v29 = vsel %vm788_vm3, %v957_v23, 0.0  ;;  %v960_v30 = vsel %vm789_vm2, %v958_v25, 0.0  ;;  %v903_v33 = vld [vmem:[#allocation2 + $0x10] sm:$0xff]  ;;  %v902_v36 = vld [vmem:[#allocation2 + $0x8] sm:$0xff]  ;;  %v1136_v53 = vpack.c.bf16 %v1129_v52, %v1128_v51 }
 0x1d9   : > { %1979 = vmatprep.subr.bf16.mxu1 %v2118_v56  ;;  %1962 = vmatpush3.bf16.msra.mxu0 %v797_v62  ;;  %v967_v35 = vpack.c.bf16 %v960_v30, %v959_v29  ;;  %v910_v38 = vpack.c.bf16 %v903_v33, %v902_v36 }
 0x1da   : > { %1963 = vmatprep.mubr.msk.bf16.mxu0 %vm2119_vm13, %v2118_v56  ;;  %1973 = vmatprep.subr.bf16.mxu0 %v2118_v56 }
 0x1df   : > { %1970 = vmatmul.mubr.msk.bf16.vlgmr.msra.gmra.mrb[8].mxu1 %vm615_vm9, %v855_v17  ;;  %1964 = vmatmul.mubr.msk.bf16.vlgmr.msra.gmra.mrb[8].mxu0 %vm615_vm9, %v798_v24 }
 0x1e0   : > { %1980 = vmatpush3.bf16.msra.mxu1 %v966_v15  ;;  %1981 = vmatprep.mubr.msk.bf16.mxu1 %vm2119_vm13, %v2118_v56 }
 0x1e1   : > { %1991 = vmatprep.subr.bf16.mxu1 %v2118_v56  ;;  %1974 = vmatpush3.bf16.msra.mxu0 %v909_v21 }
 0x1e2   : > { %1975 = vmatprep.mubr.msk.bf16.mxu0 %vm2119_vm13, %v2118_v56  ;;  %1985 = vmatprep.subr.bf16.mxu0 %v2118_v56 }
 0x1e7   : > { %1982 = vmatmul.mubr.msk.bf16.vlgmr.msra.gmra.mrb[12].mxu1 %vm615_vm9, %v967_v35  ;;  %1976 = vmatmul.mubr.msk.bf16.vlgmr.msra.gmra.mrb[12].mxu0 %vm615_vm9, %v910_v38 }
 0x1e8   : > { %1992 = vmatpush3.bf16.msra.mxu1 %v1078_v34  ;;  %1993 = vmatprep.mubr.msk.bf16.mxu1 %vm2119_vm13, %v2118_v56 }
 0x1e9   : > { %2003 = vmatprep.subr.bf16.mxu1 %v2118_v56  ;;  %1986 = vmatpush3.bf16.msra.mxu0 %v1023_v37 }
 0x1ea   : > { %1987 = vmatprep.mubr.msk.bf16.mxu0 %vm2119_vm13, %v2118_v56  ;;  %1997 = vmatprep.subr.bf16.mxu0 %v2118_v56 }
 0x1ef   : > { %1994 = vmatmul.mubr.msk.bf16.vlgmr.msra.gmra.mrb[16].mxu1 %vm615_vm9, %v1079_v48  ;;  %1988 = vmatmul.mubr.msk.bf16.vlgmr.msra.gmra.mrb[16].mxu0 %vm615_vm9, %v1024_v50 }
 0x1f0   : > { %2005 = vmatprep.mubr.msk.bf16.mxu1 %vm2119_vm13, %v2118_v56  ;;  %1998 = vmatpush3.bf16.msra.mxu0 %v1135_v49 }
 0x1f1   : > { %1999 = vmatprep.mubr.msk.bf16.mxu0 %vm2119_vm13, %v2118_v56  ;;  %2009 = vmatprep.subr.bf16.mxu0 %v2118_v56 }
 0x1f7   : > { %2000 = vmatmul.mubr.msk.bf16.vlgmr.msra.gmra.mrb[20].mxu0 %vm615_vm9, %v1136_v53 }
 0x1f8   : > { %2011 = vmatprep.mubr.msk.bf16.mxu0 %vm2119_vm13, %v2118_v56 }
 0x2aa   : > { %v763_v54 = vpop.f32.mrb[4].mxu1  ;;  %v719_v57 = vpop.f32.mrb[4].mxu0 }
 0x2ab   : > { %v1959_v55 = vpop.f32.mrb[5].mxu1  ;;  %v1953_v59 = vpop.f32.mrb[5].mxu0  ;;  %v764_v61 = vadd.f32 %v763_v54, %v719_v57  ;;  %v1839_v54 = vld [vmem:[%s2825_s7 + $0x10] sm:$0xff]  ;;  %v1221_v57 = vld [vmem:[%s2825_s7] sm:$0xff] }
 0x2ac   : > { %v766_v58 = vpop.f32.mrb[6].mxu1  ;;  %v722_v63 = vpop.f32.mrb[6].mxu0  ;;  %v1840_v55 = vld [vmem:[%s2825_s7 + $0x18] sm:$0xff]  ;;  %v2678_v59 = vstv %s1838_s24 }
 0x2ad   : > { %v1960_v62 = vpop.f32.mrb[7].mxu1  ;;  %v1954_v0 = vpop.f32.mrb[7].mxu0  ;;  %v767_v1 = vadd.f32 %v766_v58, %v722_v63  ;;  %v1222_v58 = vld [vmem:[%s2825_s7 + $0x8] sm:$0xff]  ;;  %v1224_v63 = vmul.f32 %v2678_v59, %v1221_v57 }
 0x2ae   : > { %v1234_v62 = vmul.f32 %v1840_v55, %v2678_v59  ;;  %v1225_v0 = vmul.f32 %v2678_v59, %v1222_v58  ;;  %v1855_v58 = vld [vmem:[%s2825_s7 + $0x60] sm:$0xff] }
 0x2b2   : > { %v893_v2 = vpop.f32.mrb[8].mxu1  ;;  %v836_v5 = vpop.f32.mrb[8].mxu0 }
 0x2b3   : > { %v1971_v4 = vpop.f32.mrb[9].mxu1  ;;  %v843_v7 = vadd.f32 %v836_v5, %v764_v61  ;;  %v1965_v9 = vpop.f32.mrb[9].mxu0  ;;  %v1233_v61 = vmul.f32 %v1839_v54, %v2678_v59 }
 0x2b4   : > { %v896_v6 = vpop.f32.mrb[10].mxu1  ;;  %v839_v11 = vpop.f32.mrb[10].mxu0 }
 0x2b5   : > { %v1972_v10 = vpop.f32.mrb[11].mxu1  ;;  %v900_v12 = vadd.f32 %v893_v2, %v843_v7  ;;  %v844_v13 = vadd.f32 %v839_v11, %v767_v1  ;;  %v1966_v14 = vpop.f32.mrb[11].mxu0  ;;  %v1235_v1 = vpack.c.bf16 %v1234_v62, %v1233_v61  ;;  %v1226_v2 = vpack.c.bf16 %v1225_v0, %v1224_v63  ;;  %v1856_v61 = vld [vmem:[%s2825_s7 + $0x68] sm:$0xff]  ;;  %v1858_v63 = vld [vmem:[%s2825_s7 + $0x70] sm:$0xff]  ;;  %v1859_v0 = vld [vmem:[%s2825_s7 + $0x78] sm:$0xff] }
 0x2b7   : > { %v901_v15 = vadd.f32 %v896_v6, %v844_v13  ;;  %2004 = vmatpush3.bf16.msra.mxu1 %v1235_v1  ;;  %2010 = vmatpush3.bf16.msra.mxu0 %v1226_v2  ;;  %v1558_v1 = vmul.f32 %v1855_v58, %v2678_v59  ;;  %v1559_v2 = vmul.f32 %v1856_v61, %v2678_v59 }
 0x2b8   : > { %2015 = vmatprep.subr.bf16.mxu1 %v2118_v56  ;;  %2021 = vmatprep.subr.bf16.mxu0 %v2118_v56 }
 0x2ba   : > { %v1005_v17 = vpop.f32.mrb[12].mxu1  ;;  %v948_v19 = vpop.f32.mrb[12].mxu0 }
 0x2bb   : > { %v1983_v18 = vpop.f32.mrb[13].mxu1  ;;  %v955_v21 = vadd.f32 %v948_v19, %v900_v12  ;;  %v1977_v22 = vpop.f32.mrb[13].mxu0 }
 0x2bc   : > { %v1008_v20 = vpop.f32.mrb[14].mxu1  ;;  %v951_v24 = vpop.f32.mrb[14].mxu0  ;;  %v1846_v22 = vld [vmem:[%s2825_s7 + $0x30] sm:$0xff] }
 0x2bd   : > { %v1984_v23 = vpop.f32.mrb[15].mxu1  ;;  %v1012_v25 = vadd.f32 %v1005_v17, %v955_v21  ;;  %v956_v26 = vadd.f32 %v951_v24, %v901_v15  ;;  %v1978_v27 = vpop.f32.mrb[15].mxu0  ;;  %v1844_v21 = vld [vmem:[%s2825_s7 + $0x28] sm:$0xff] }
 0x2be   : > { %v1847_v23 = vld [vmem:[%s2825_s7 + $0x38] sm:$0xff] }
 0x2bf   : > { %v1013_v28 = vadd.f32 %v1008_v20, %v956_v26  ;;  %v1843_v20 = vld [vmem:[%s2825_s7 + $0x20] sm:$0xff]  ;;  %v1389_v26 = vmul.f32 %v1846_v22, %v2678_v59  ;;  %v1390_v27 = vmul.f32 %v1847_v23, %v2678_v59 }
 0x2c0   : > { %v1332_v24 = vmul.f32 %v1843_v20, %v2678_v59 }
 0x2c2   : > { %v1117_v29 = vpop.f32.mrb[16].mxu1  ;;  %v1062_v31 = vpop.f32.mrb[16].mxu0 }
 0x2c3   : > { %v1995_v30 = vpop.f32.mrb[17].mxu1  ;;  %v1069_v33 = vadd.f32 %v1062_v31, %v1012_v25  ;;  %v1989_v34 = vpop.f32.mrb[17].mxu0  ;;  %v1333_v25 = vmul.f32 %v1844_v21, %v2678_v59 }
 0x2c4   : > { %v1120_v32 = vpop.f32.mrb[18].mxu1  ;;  %v1065_v36 = vpop.f32.mrb[18].mxu0 }
 0x2c5   : > { %v1996_v35 = vpop.f32.mrb[19].mxu1  ;;  %v1124_v37 = vadd.f32 %v1117_v29, %v1069_v33  ;;  %v1070_v38 = vadd.f32 %v1065_v36, %v1013_v28  ;;  %v1990_v39 = vpop.f32.mrb[19].mxu0  ;;  %v1334_v31 = vpack.c.bf16 %v1333_v25, %v1332_v24  ;;  %v1391_v36 = vpack.c.bf16 %v1390_v27, %v1389_v26 }
 0x2c7   : > { %v1125_v41 = vadd.f32 %v1120_v32, %v1070_v38  ;;  %v1850_v38 = vld [vmem:[%s2825_s7 + $0x48] sm:$0xff] }
 0x2ca   : > { %v1174_v42 = vpop.f32.mrb[20].mxu0 }
 0x2cb   : > { %v1181_v44 = vadd.f32 %v1174_v42, %v1124_v37  ;;  %v2001_v45 = vpop.f32.mrb[21].mxu0  ;;  %v1849_v37 = vld [vmem:[%s2825_s7 + $0x40] sm:$0xff]  ;;  %v1853_v42 = vld [vmem:[%s2825_s7 + $0x58] sm:$0xff] }
 0x2cc   : > { %v1177_v8 = vpop.f32.mrb[22].mxu0  ;;  %v1445_v45 = vmul.f32 %v1850_v38, %v2678_v59 }
 0x2cd   : > { %v1190_v47 = vadd.f32 %v1837_v43, %v1181_v44  ;;  %v1182_v48 = vadd.f32 %v1177_v8, %v1125_v41  ;;  %v2002_v49 = vpop.f32.mrb[23].mxu0  ;;  %v1852_v41 = vld [vmem:[%s2825_s7 + $0x50] sm:$0xff]  ;;  %v1444_v44 = vmul.f32 %v1849_v37, %v2678_v59 }
 0x2ce   : > { %v1502_v49 = vmul.f32 %v1853_v42, %v2678_v59 }
 0x2cf   : > { %v1191_v50 = vadd.f32 %v1837_v43, %v1182_v48  ;;  %v1192_v16 = vmul.f32 %v1190_v47, %v1190_v47  ;;  %v1501_v48 = vmul.f32 %v1852_v41, %v2678_v59 }
 0x2d1   : > { %v1194_v51 = vsel %vm615_vm9, %v1192_v16, 0.0  ;;  %v1193_v52 = vmul.f32 %v1191_v50, %v1191_v50  ;;  %v1503_v57 = vpack.c.bf16 %v1502_v49, %v1501_v48 }
 0x2d2   : > { %1195 = vadd.xlane.f32.xlu1 %v1194_v51 }
 0x2d3   : > { %v1197_v53 = vsel %vm615_vm9, %v1193_v52, 0.0 }
 0x2d6   : > { %1198 = vadd.xlane.f32.xlu1 %v1197_v53  ;;  %v1446_v53 = vpack.c.bf16 %v1445_v45, %v1444_v44 }
 0x35f   : > { %v1196_v4 = vpop.xlane.xlu1 %1195 }
 0x360   : > { %v1200_v5 = vmul.f32 0.0625, %v1196_v4 }
 0x362   : > { %v1202_v6 = vadd.f32 1e-08, %v1200_v5 }
 0x363   : > { %v1199_v7 = vpop.xlane.xlu1 %1198 }
 0x364   : > { %2085 = vrsqrt.f32 %v1202_v6  ;;  %v1201_v9 = vmul.f32 0.0625, %v1199_v7  ;;  %v1613_v6 = vmul.f32 %v1858_v63, %v2678_v59  ;;  %v1614_v7 = vmul.f32 %v1859_v0, %v2678_v59 }
 0x366   : > { %v1203_v10 = vadd.f32 1e-08, %v1201_v9 }
 0x368   : > { %2087 = vrsqrt.f32 %v1203_v10 }
 0x36e   : > { %v2086_v11 = vpop.eup %2085 }
 0x36f   : > { %v1206_v12 = vmul.f32 %v2086_v11, %v1190_v47 }
 0x371   : > { %vm1208_vm4 = vcmp.ge.f32.partialorder %v1206_v12, 0.0  ;;  %v1210_v13 = vmul.f32 0.2, %v1206_v12 }
 0x372   : > { %v2088_v14 = vpop.eup %2087 }
 0x373   : > { %v1212_v15 = vsel %vm1208_vm4, %v1206_v12, %v1210_v13  ;;  %v1207_v17 = vmul.f32 %v2088_v14, %v1191_v50  ;;  %v1560_v13 = vpack.c.bf16 %v1559_v2, %v1558_v1 }
 0x374   : > { %1214 = vst.msk [vmem:[#allocation2 + $0x8] sm:$0xff] %vm615_vm9, %v1212_v15  ;;  %v1615_v15 = vpack.c.bf16 %v1614_v7, %v1613_v6 }
 0x375   : > { %vm1209_vm5 = vcmp.ge.f32.partialorder %v1207_v17, 0.0  ;;  %v1211_v18 = vmul.f32 0.2, %v1207_v17 }
 0x377   : > { %v1213_v19 = vsel %vm1209_vm5, %v1207_v17, %v1211_v18  ;;  %v1861_v17 = vld [vmem:[%s2825_s7 + $0x80] sm:$0xff]  ;;  %v1862_v18 = vld [vmem:[%s2825_s7 + $0x88] sm:$0xff] }
 0x378   : > { %1215 = vst.msk [vmem:[#allocation2 + $0x10] sm:$0xff] %vm615_vm9, %v1213_v19  ;;  %v1670_v21 = vmul.f32 %v1861_v17, %v2678_v59  ;;  %v1671_v22 = vmul.f32 %v1862_v18, %v2678_v59 }
 0x37a   : > { %v1672_v26 = vpack.c.bf16 %v1671_v22, %v1670_v21 }
 0x37b   : > { %v1217_v28 = vld [vmem:[#allocation2 + $0x3] sm:$0xff] }
 0x37c   : > { %v1228_v29 = vld [vmem:[#allocation2 + $0x4] sm:$0xff]  ;;  %v1219_v34 = vsel %vm662_vm0, %v1217_v28, 0.0 }
 0x37d   : > { %v1325_v47 = vld [vmem:[#allocation2 + $0x5] sm:$0xff] }
 0x37e   : > { %v1382_v16 = vld [vmem:[#allocation2 + $0x7] sm:$0xff]  ;;  %v1327_v52 = vsel %vm788_vm3, %v1325_v47, 0.0 }
 0x37f   : > { %v2704_v30 = vld [vmem:[#allocation2 + $0xc] sm:$0xff]  ;;  %v1384_v55 = vsel %vm662_vm0, %v1382_v16, 0.0  ;;  %v1609_v25 = vld [vmem:[#allocation2 + $0x14] sm:$0xff] }
 0x380   : > { %v2706_v32 = vld [vmem:[#allocation2 + $0xb] sm:$0xff]  ;;  %v1236_v33 = vpack.c.bf16 %v2704_v30, %v1228_v29  ;;  %v1552_v20 = vld [vmem:[#allocation2 + $0x13] sm:$0xff]  ;;  %v1616_v59 = vpack.c.bf16 %v1609_v25, %v2704_v30 }
 0x381   : > { %v1220_v35 = vsel %vm663_vm1, %v2706_v32, 0.0  ;;  %v2727_v43 = vld [vmem:[#allocation2 + $0xd] sm:$0xff]  ;;  %v1553_v23 = vsel %vm662_vm0, %v2706_v32, 0.0  ;;  %v1554_v24 = vsel %vm663_vm1, %v1552_v20, 0.0  ;;  %v1664_v28 = vld [vmem:[#allocation2 + $0x15] sm:$0xff] }
 0x382   : > { %v1227_v39 = vpack.c.bf16 %v1220_v35, %v1219_v34  ;;  %2006 = vmatmul.mubr.msk.bf16.vlgmr.msra.gmra.mrb[20].mxu1 %vm615_vm9, %v1236_v33  ;;  %v1383_v8 = vld [vmem:[#allocation2 + $0xf] sm:$0xff]  ;;  %v1328_v50 = vsel %vm789_vm2, %v2727_v43, 0.0  ;;  %v1561_v27 = vpack.c.bf16 %v1554_v24, %v1553_v23  ;;  %v1665_v40 = vsel %vm788_vm3, %v2727_v43, 0.0 }
 0x383   : > { %2016 = vmatpush3.bf16.msra.mxu1 %v1334_v31  ;;  %2017 = vmatprep.mubr.msk.bf16.mxu1 %vm2119_vm13, %v2118_v56  ;;  %v1385_v51 = vsel %vm663_vm1, %v1383_v8, 0.0  ;;  %v1335_v54 = vpack.c.bf16 %v1328_v50, %v1327_v52  ;;  %v1494_v4 = vld [vmem:[#allocation2 + $0x9] sm:$0xff]  ;;  %v1495_v5 = vld [vmem:[#allocation2 + $0x11] sm:$0xff]  ;;  %v1666_v46 = vsel %vm789_vm2, %v1664_v28, 0.0 }
 0x384   : > { %2012 = vmatmul.mubr.msk.bf16.vlgmr.msra.gmra.mrb[24].mxu0 %vm615_vm9, %v1227_v39  ;;  %2027 = vmatprep.subr.bf16.mxu1 %v2118_v56  ;;  %v1392_v62 = vpack.c.bf16 %v1385_v51, %v1384_v55  ;;  %v1440_v9 = vld [vmem:[#allocation2 + $0x10] sm:$0xff]  ;;  %v1496_v10 = vsel %vm788_vm3, %v1494_v4, 0.0  ;;  %v1497_v11 = vsel %vm789_vm2, %v1495_v5, 0.0  ;;  %v1439_v12 = vld [vmem:[#allocation2 + $0x8] sm:$0xff]  ;;  %v1673_v29 = vpack.c.bf16 %v1666_v46, %v1665_v40 }
 0x385   : > { %2022 = vmatpush3.bf16.msra.mxu0 %v1391_v36  ;;  %2023 = vmatprep.mubr.msk.bf16.mxu0 %vm2119_vm13, %v2118_v56  ;;  %v1447_v14 = vpack.c.bf16 %v1440_v9, %v1439_v12  ;;  %v1504_v19 = vpack.c.bf16 %v1497_v11, %v1496_v10 }
 0x386   : > { %2033 = vmatprep.subr.bf16.mxu0 %v2118_v56 }
 0x38a   : > { %2018 = vmatmul.mubr.msk.bf16.vlgmr.msra.gmra.mrb[24].mxu1 %vm615_vm9, %v1335_v54 }
 0x38b   : > { %2028 = vmatpush3.bf16.msra.mxu1 %v1446_v53  ;;  %2029 = vmatprep.mubr.msk.bf16.mxu1 %vm2119_vm13, %v2118_v56 }
 0x38c   : > { %2024 = vmatmul.mubr.msk.bf16.vlgmr.msra.gmra.mrb[28].mxu0 %vm615_vm9, %v1392_v62  ;;  %2039 = vmatprep.subr.bf16.mxu1 %v2118_v56 }
 0x38d   : > { %2034 = vmatpush3.bf16.msra.mxu0 %v1503_v57  ;;  %2035 = vmatprep.mubr.msk.bf16.mxu0 %vm2119_vm13, %v2118_v56 }
 0x38e   : > { %2045 = vmatprep.subr.bf16.mxu0 %v2118_v56 }
 0x392   : > { %2030 = vmatmul.mubr.msk.bf16.vlgmr.msra.gmra.mrb[28].mxu1 %vm615_vm9, %v1447_v14 }
 0x393   : > { %2040 = vmatpush3.bf16.msra.mxu1 %v1560_v13  ;;  %2041 = vmatprep.mubr.msk.bf16.mxu1 %vm2119_vm13, %v2118_v56 }
 0x394   : > { %2036 = vmatmul.mubr.msk.bf16.vlgmr.msra.gmra.mrb[32].mxu0 %vm615_vm9, %v1504_v19  ;;  %2051 = vmatprep.subr.bf16.mxu1 %v2118_v56 }
 0x395   : > { %2046 = vmatpush3.bf16.msra.mxu0 %v1615_v15  ;;  %2047 = vmatprep.mubr.msk.bf16.mxu0 %vm2119_vm13, %v2118_v56  ;;  %v1864_v15 = vld [vmem:[%s2826_s8] ss:$0 sm:$0xff] }
 0x39a   : > { %2042 = vmatmul.mubr.msk.bf16.vlgmr.msra.gmra.mrb[32].mxu1 %vm615_vm9, %v1561_v27 }
 0x39b   : > { %2052 = vmatpush3.bf16.msra.mxu1 %v1672_v26  ;;  %2053 = vmatprep.mubr.msk.bf16.mxu1 %vm2119_vm13, %v2118_v56 }
 0x39c   : > { %2048 = vmatmul.mubr.msk.bf16.vlgmr.msra.gmra.mrb[36].mxu0 %vm615_vm9, %v1616_v59 }
 0x3a2   : > { %2054 = vmatmul.mubr.msk.bf16.vlgmr.msra.gmra.mrb[36].mxu1 %vm615_vm9, %v1673_v29 }
 0x455   : > { %v1274_v30 = vpop.f32.mrb[20].mxu1 }
 0x456   : > { %v2007_v31 = vpop.f32.mrb[21].mxu1 }
 0x457   : > { %v1318_v32 = vpop.f32.mrb[24].mxu0  ;;  %v1277_v34 = vpop.f32.mrb[22].mxu1 }
 0x458   : > { %v1319_v33 = vadd.f32 %v1318_v32, %v1274_v30  ;;  %v2013_v35 = vpop.f32.mrb[25].mxu0  ;;  %v2008_v36 = vpop.f32.mrb[23].mxu1 }
 0x459   : > { %v1321_v37 = vpop.f32.mrb[26].mxu0 }
 0x45a   : > { %v1322_v38 = vadd.f32 %v1321_v37, %v1277_v34  ;;  %v2014_v56 = vpop.f32.mrb[27].mxu0 }
 0x45d   : > { %v1373_v39 = vpop.f32.mrb[24].mxu1 }
 0x45e   : > { %v1380_v41 = vadd.f32 %v1373_v39, %v1319_v33  ;;  %v2019_v3 = vpop.f32.mrb[25].mxu1 }
 0x45f   : > { %v1430_v42 = vpop.f32.mrb[28].mxu0  ;;  %v1376_v43 = vpop.f32.mrb[26].mxu1 }
 0x460   : > { %v2025_v60 = vpop.f32.mrb[29].mxu0  ;;  %v1437_v44 = vadd.f32 %v1430_v42, %v1380_v41  ;;  %v1381_v45 = vadd.f32 %v1376_v43, %v1322_v38  ;;  %v2020_v8 = vpop.f32.mrb[27].mxu1 }
 0x461   : > { %v1433_v47 = vpop.f32.mrb[30].mxu0 }
 0x462   : > { %v2026_v48 = vpop.f32.mrb[31].mxu0  ;;  %v1438_v49 = vadd.f32 %v1433_v47, %v1381_v45 }
 0x465   : > { %v1485_v50 = vpop.f32.mrb[28].mxu1 }
 0x466   : > { %v1492_v16 = vadd.f32 %v1485_v50, %v1437_v44  ;;  %v2031_v51 = vpop.f32.mrb[29].mxu1 }
 0x467   : > { %v1542_v52 = vpop.f32.mrb[32].mxu0  ;;  %v1488_v53 = vpop.f32.mrb[30].mxu1 }
 0x468   : > { %v2037_v54 = vpop.f32.mrb[33].mxu0  ;;  %v1549_v55 = vadd.f32 %v1542_v52, %v1492_v16  ;;  %v1493_v57 = vadd.f32 %v1488_v53, %v1438_v49  ;;  %v2032_v58 = vpop.f32.mrb[31].mxu1 }
 0x469   : > { %v1545_v61 = vpop.f32.mrb[34].mxu0 }
 0x46a   : > { %v2038_v62 = vpop.f32.mrb[35].mxu0  ;;  %v1550_v63 = vadd.f32 %v1545_v61, %v1493_v57 }
 0x46d   : > { %v1599_v0 = vpop.f32.mrb[32].mxu1 }
 0x46e   : > { %v1606_v1 = vadd.f32 %v1599_v0, %v1549_v55  ;;  %v2043_v2 = vpop.f32.mrb[33].mxu1 }
 0x46f   : > { %v1654_v4 = vpop.f32.mrb[36].mxu0  ;;  %v1602_v5 = vpop.f32.mrb[34].mxu1 }
 0x470   : > { %v2049_v6 = vpop.f32.mrb[37].mxu0  ;;  %v1661_v7 = vadd.f32 %v1654_v4, %v1606_v1  ;;  %v1607_v9 = vadd.f32 %v1602_v5, %v1550_v63  ;;  %v2044_v10 = vpop.f32.mrb[35].mxu1 }
 0x471   : > { %v1657_v11 = vpop.f32.mrb[38].mxu0 }
 0x472   : > { %v2050_v12 = vpop.f32.mrb[39].mxu0  ;;  %v1662_v13 = vadd.f32 %v1657_v11, %v1607_v9 }
 0x475   : > { %v1711_v14 = vpop.f32.mrb[36].mxu1 }
 0x476   : > { %v1718_v17 = vadd.f32 %v1711_v14, %v1661_v7  ;;  %v2055_v18 = vpop.f32.mrb[37].mxu1 }
 0x477   : > { %v1714_v19 = vpop.f32.mrb[38].mxu1 }
 0x478   : > { %v1727_v20 = vadd.f32 %v1864_v15, %v1718_v17  ;;  %v1719_v21 = vadd.f32 %v1714_v19, %v1662_v13  ;;  %v2056_v22 = vpop.f32.mrb[39].mxu1 }
 0x47a   : > { %1730 = vst.msk [vmem:[%s346_s25] sm:$0xff] %vm1729_vm6, %v1727_v20  ;;  %v1728_v23 = vadd.f32 %v1864_v15, %v1719_v21 }
 0x47c   : > { %1731 = vst.msk [vmem:[%s346_s25 + $0x8] sm:$0xff] %vm1729_vm6, %v1728_v23 }
 0x47d PF: > { %s20_s30 = sadd.s32 1, %s2114_s30  }
 0x47e   : > { %p17_p1 = scmp.ge.s32.totalorder %s20_s30, 4  }
 0x480   :  { %19 = sbr.rel (!%p17_p1) target bundleno = 1 (0x1), region = 107 }
 0x487   :  { %1753 = vsyncpa [#allocation4], 1 }
 0x488   :  { %1755 = vsyncpa [#allocation4 + $0x1], 1 }

</bundles_post_ra>
